<compile_context>
chip_gen: v6e
topology: v6e:2x2x1
jax: 0.10.0
libtpu: 0.0.40
codegen_flags: <defaults>
</compile_context>

<pallas_src>
import numpy as np
import jax
import jax.numpy as jnp
from jax.experimental import pallas as pl
from jax.experimental.pallas import tpu as pltpu


def _relu(x):
    return jnp.maximum(x, 0.0)


def _conv1d_k3(h, w_ref, b_ref):
    """Conv1d(kernel_size=3, valid) as 3 accumulating MXU dots (no im2col concat).

    h:     (N, T, Cin) float32 activation value.
    w_ref: (1, 3, Cin, Cout) bfloat16 per-class weight block.
    b_ref: (1, 1, Cout) float32 per-class bias block.
    returns (N, T-2, Cout) float32.
    """
    n, t, cin = h.shape
    cout = w_ref.shape[-1]
    tout = t - 2
    acc = None
    for j in range(3):                       # 3 taps -> 3 accumulating dots
        lhs = h[:, j:j + tout, :].reshape(n * tout, cin).astype(jnp.bfloat16)
        y = jnp.dot(lhs, w_ref[0, j], preferred_element_type=jnp.float32)
        acc = y if acc is None else acc + y
    acc = acc + b_ref[0]                     # f32 bias add on the VPU
    return acc.reshape(n, tout, cout)


def _maxpool1d_2(h):
    """MaxPool1d(kernel_size=2, stride=2) along time (floor semantics)."""
    n, t, c = h.shape
    t2 = t // 2
    hr = h[:, : t2 * 2, :].reshape(n, t2, 2, c)
    return jnp.maximum(hr[:, :, 0, :], hr[:, :, 1, :])


def _sodcnn_kernel(x_ref, w1_ref, b1_ref, w2_ref, b2_ref, w3_ref, b3_ref,
                   w4_ref, b4_ref, wf1_ref, bf1_ref, wf2_ref, bf2_ref,
                   out_ref):
    # One grid step == one class (motor unit); weights arrive as (1, ...) blocks.
    x = x_ref[...]                                        # (N, L, C) f32
    h = _relu(_conv1d_k3(x, w1_ref, b1_ref))              # Conv1d + ReLU
    h = _relu(_conv1d_k3(h, w2_ref, b2_ref))              # Conv1d + ReLU
    h = _maxpool1d_2(h)                                   # MaxPool1d(2, 2)
    # TODO(synk): Dropout(p=0.5) layers are identity here (inference mode).
    h = _relu(_conv1d_k3(h, w3_ref, b3_ref))              # Conv1d + ReLU
    h = _relu(_conv1d_k3(h, w4_ref, b4_ref))              # Conv1d + ReLU
    h = _maxpool1d_2(h)                                   # (N, L2, 64)

    n, l2, ch = h.shape
    # Flatten + LazyLinear(256): single contraction over L2*64.
    fc = jnp.dot(h.reshape(n, l2 * ch).astype(jnp.bfloat16), wf1_ref[0],
                 preferred_element_type=jnp.float32) + bf1_ref[0]
    fc = _relu(fc)

    o = jnp.dot(fc.astype(jnp.bfloat16), wf2_ref[0],
                preferred_element_type=jnp.float32) + bf2_ref[0]     # (N, 1)
    sig = pl.reciprocal(1.0 + jnp.exp(-o), approx=True)   # Sigmoid: exp + recip on EUP
    out_ref[...] = sig[None]                              # (1, N, 1) block, lane-dense write


def sodcnn_forward(x_ncl, params):
    """x_ncl: (N, C, L) float32 (PyTorch Conv1d layout). Returns (N, classes)."""
    (w1, b1, w2, b2, w3, b3, w4, b4, wf1, bf1, wf2, bf2) = params
    classes = w1.shape[0]
    n, c, l = x_ncl.shape
    x = jnp.transpose(x_ncl, (0, 2, 1)).astype(jnp.float32)   # (N, L, C)

    # Host-side layout/precision prep: bf16 weights (halves weight DMA bytes),
    # LazyLinear weight folded to a single (L2*64, 256) contraction dim.
    bf16 = jnp.bfloat16
    w1b = w1.astype(bf16)
    w2b = w2.astype(bf16)
    w3b = w3.astype(bf16)
    w4b = w4.astype(bf16)
    l2, ch4 = wf1.shape[1], wf1.shape[2]
    wf1b = wf1.reshape(classes, l2 * ch4, wf1.shape[3]).astype(bf16)
    wf2b = wf2.astype(bf16)

    def wspec(shape):
        nd = len(shape)
        return pl.BlockSpec((1,) + tuple(shape[1:]),
                            lambda i, _nd=nd: (i,) + (0,) * (_nd - 1))

    in_specs = [
        pl.BlockSpec((n, l, c), lambda i: (0, 0, 0)),    # x: shared across classes
        wspec(w1b.shape), wspec(b1.shape),
        wspec(w2b.shape), wspec(b2.shape),
        wspec(w3b.shape), wspec(b3.shape),
        wspec(w4b.shape), wspec(b4.shape),
        wspec(wf1b.shape), wspec(bf1.shape),
        wspec(wf2b.shape), wspec(bf2.shape),
    ]

    out_cls = pl.pallas_call(
        _sodcnn_kernel,
        grid=(classes,),
        out_shape=jax.ShapeDtypeStruct((classes, n, 1), jnp.float32),
        in_specs=in_specs,
        out_specs=pl.BlockSpec((1, n, 1), lambda i: (i, 0, 0)),
        compiler_params=pltpu.CompilerParams(
            dimension_semantics=("parallel",)),     # classes shard across v7x's 2 TCs
    )(x, w1b, b1, w2b, b2, w3b, b3, w4b, b4, wf1b, bf1, wf2b, bf2)

    return out_cls[:, :, 0].T                        # (N, classes)


def reference_forward(x_ncl, params):
    """Pure-JAX (non-Pallas) f32 reference with identical math."""
    (w1, b1, w2, b2, w3, b3, w4, b4, wf1, bf1, wf2, bf2) = params
    classes = w1.shape[0]
    x = jnp.transpose(x_ncl, (0, 2, 1)).astype(jnp.float32)
    hp = jax.lax.Precision.HIGHEST

    def conv(h, w, b):
        tout = h.shape[1] - 2
        acc = b
        for j in range(3):
            acc = acc + jnp.einsum('ntc,cd->ntd', h[:, j:j + tout, :], w[j],
                                   precision=hp)
        return acc

    def pool(h):
        n, t, c = h.shape
        return jnp.max(h[:, :(t // 2) * 2, :].reshape(n, t // 2, 2, c), axis=2)

    outs = []
    for ci in range(classes):
        h = x
        h = jnp.maximum(conv(h, w1[ci], b1[ci]), 0.0)
        h = jnp.maximum(conv(h, w2[ci], b2[ci]), 0.0)
        h = pool(h)
        h = jnp.maximum(conv(h, w3[ci], b3[ci]), 0.0)
        h = jnp.maximum(conv(h, w4[ci], b4[ci]), 0.0)
        h = pool(h)
        fc = bf1[ci] + jnp.einsum('ntc,tcd->nd', h, wf1[ci], precision=hp)
        fc = jnp.maximum(fc, 0.0)
        o = jnp.dot(fc, wf2[ci], precision=hp) + bf2[ci]
        outs.append(jax.nn.sigmoid(o))
    return jnp.concatenate(outs, axis=1)


if __name__ == "__main__":
    N, C, L, CLASSES = 2, 4, 24, 3                 # batch, EMG channels, seq len, MUs
    num_nodes = [128, 128, 128, 64, 256]
    L2 = ((L - 4) // 2 - 4) // 2                   # time length after both pools

    key = jax.random.PRNGKey(0)
    ks = jax.random.split(key, 13)

    def rnd(k, shape, s=0.05):
        return jax.random.normal(k, shape, jnp.float32) * s

    w1 = rnd(ks[0], (CLASSES, 3, C, num_nodes[0]), 0.2)
    b1 = rnd(ks[1], (CLASSES, 1, num_nodes[0]))
    w2 = rnd(ks[2], (CLASSES, 3, num_nodes[0], num_nodes[1]))
    b2 = rnd(ks[3], (CLASSES, 1, num_nodes[1]))
    w3 = rnd(ks[4], (CLASSES, 3, num_nodes[1], num_nodes[2]))
    b3 = rnd(ks[5], (CLASSES, 1, num_nodes[2]))
    w4 = rnd(ks[6], (CLASSES, 3, num_nodes[2], num_nodes[3]))
    b4 = rnd(ks[7], (CLASSES, 1, num_nodes[3]))
    wf1 = rnd(ks[8], (CLASSES, L2, num_nodes[3], num_nodes[4]))
    bf1 = rnd(ks[9], (CLASSES, 1, num_nodes[4]))
    wf2 = rnd(ks[10], (CLASSES, num_nodes[4], 1))
    bf2 = rnd(ks[11], (CLASSES, 1, 1))
    params = (w1, b1, w2, b2, w3, b3, w4, b4, wf1, bf1, wf2, bf2)

    x = jax.random.normal(ks[12], (N, C, L), jnp.float32)

    out = jax.block_until_ready(sodcnn_forward(x, params))
    ref = jax.block_until_ready(reference_forward(x, params))

    assert out.shape == (N, CLASSES), out.shape
    # Tolerance relaxed vs pure-f32 because matmul operands are bf16 (f32 accum).
    np.testing.assert_allclose(np.asarray(out), np.asarray(ref),
                               atol=1e-2, rtol=1e-2)
    print("KERNEL_OK")
</pallas_src>

<mosaic_0001>
module attributes {stable_mosaic.version = 11 : i64} {
  func.func @_sodcnn_kernel(%arg0: i32, %arg1: memref<2x24x4xf32, #tpu.memory_space<vmem>>, %arg2: memref<1x3x4x128xbf16, #tpu.memory_space<vmem>>, %arg3: memref<1x1x128xf32, #tpu.memory_space<vmem>>, %arg4: memref<1x3x128x128xbf16, #tpu.memory_space<vmem>>, %arg5: memref<1x1x128xf32, #tpu.memory_space<vmem>>, %arg6: memref<1x3x128x128xbf16, #tpu.memory_space<vmem>>, %arg7: memref<1x1x128xf32, #tpu.memory_space<vmem>>, %arg8: memref<1x3x128x64xbf16, #tpu.memory_space<vmem>>, %arg9: memref<1x1x64xf32, #tpu.memory_space<vmem>>, %arg10: memref<1x192x256xbf16, #tpu.memory_space<vmem>>, %arg11: memref<1x1x256xf32, #tpu.memory_space<vmem>>, %arg12: memref<1x256x1xbf16, #tpu.memory_space<vmem>>, %arg13: memref<1x1x1xf32, #tpu.memory_space<vmem>>, %arg14: memref<1x2x1xf32, #tpu.memory_space<vmem>>) attributes {dimension_semantics = [#tpu.dimension_semantics<parallel>], iteration_bounds = array<i64: 3>, scalar_prefetch = 0 : i64, scratch_operands = 0 : i64, tpu.core_type = #tpu.core_type<tc>, window_params = [{pipeline_mode = #tpu.pipeline_mode<synchronous>, transform_indices = @transform_0, window_bounds = array<i64: 2, 24, 4>}, {transform_indices = @transform_1, window_bounds = array<i64: 1, 3, 4, 128>}, {transform_indices = @transform_2, window_bounds = array<i64: 1, 1, 128>}, {transform_indices = @transform_3, window_bounds = array<i64: 1, 3, 128, 128>}, {transform_indices = @transform_4, window_bounds = array<i64: 1, 1, 128>}, {transform_indices = @transform_5, window_bounds = array<i64: 1, 3, 128, 128>}, {transform_indices = @transform_6, window_bounds = array<i64: 1, 1, 128>}, {transform_indices = @transform_7, window_bounds = array<i64: 1, 3, 128, 64>}, {transform_indices = @transform_8, window_bounds = array<i64: 1, 1, 64>}, {transform_indices = @transform_9, window_bounds = array<i64: 1, 192, 256>}, {transform_indices = @transform_10, window_bounds = array<i64: 1, 1, 256>}, {transform_indices = @transform_11, window_bounds = array<i64: 1, 256, 1>}, {transform_indices = @transform_12, window_bounds = array<i64: 1, 1, 1>}, {transform_indices = @transform_13, window_bounds = array<i64: 1, 2, 1>}]} {
    %c0 = arith.constant 0 : index
    %c0_0 = arith.constant 0 : index
    %c0_1 = arith.constant 0 : index
    %0 = vector.load %arg1[%c0, %c0_0, %c0_1] : memref<2x24x4xf32, #tpu.memory_space<vmem>>, vector<2x24x4xf32>
    %1 = vector.extract_strided_slice %0 {offsets = [0, 0, 0], sizes = [2, 22, 4], strides = [1, 1, 1]} : vector<2x24x4xf32> to vector<2x22x4xf32>
    %2 = vector.shape_cast %1 : vector<2x22x4xf32> to vector<44x4xf32>
    %3 = arith.truncf %2 : vector<44x4xf32> to vector<44x4xbf16>
    %c0_2 = arith.constant 0 : index
    %c0_3 = arith.constant 0 : index
    %c0_4 = arith.constant 0 : index
    %c0_5 = arith.constant 0 : index
    %4 = vector.load %arg2[%c0_2, %c0_3, %c0_4, %c0_5] : memref<1x3x4x128xbf16, #tpu.memory_space<vmem>>, vector<1x1x4x128xbf16>
    %5 = vector.shape_cast %4 : vector<1x1x4x128xbf16> to vector<4x128xbf16>
    %cst = arith.constant dense<0.000000e+00> : vector<44x128xf32>
    %6 = tpu.matmul %3, %5, %cst {dimension_numbers = #tpu.dot_dimension_numbers<[1], [0], [0], [1], [0, 0, 1, 1], [], []>} : vector<44x4xbf16>, vector<4x128xbf16>, vector<44x128xf32> -> vector<44x128xf32>
    %7 = vector.extract_strided_slice %0 {offsets = [0, 1, 0], sizes = [2, 22, 4], strides = [1, 1, 1]} : vector<2x24x4xf32> to vector<2x22x4xf32>
    %8 = vector.shape_cast %7 : vector<2x22x4xf32> to vector<44x4xf32>
    %9 = arith.truncf %8 : vector<44x4xf32> to vector<44x4xbf16>
    %c0_6 = arith.constant 0 : index
    %c1 = arith.constant 1 : index
    %c0_7 = arith.constant 0 : index
    %c0_8 = arith.constant 0 : index
    %10 = vector.load %arg2[%c0_6, %c1, %c0_7, %c0_8] : memref<1x3x4x128xbf16, #tpu.memory_space<vmem>>, vector<1x1x4x128xbf16>
    %11 = vector.shape_cast %10 : vector<1x1x4x128xbf16> to vector<4x128xbf16>
    %cst_9 = arith.constant dense<0.000000e+00> : vector<44x128xf32>
    %12 = tpu.matmul %9, %11, %cst_9 {dimension_numbers = #tpu.dot_dimension_numbers<[1], [0], [0], [1], [0, 0, 1, 1], [], []>} : vector<44x4xbf16>, vector<4x128xbf16>, vector<44x128xf32> -> vector<44x128xf32>
    %13 = arith.addf %6, %12 : vector<44x128xf32>
    %14 = vector.extract_strided_slice %0 {offsets = [0, 2, 0], sizes = [2, 22, 4], strides = [1, 1, 1]} : vector<2x24x4xf32> to vector<2x22x4xf32>
    %15 = vector.shape_cast %14 : vector<2x22x4xf32> to vector<44x4xf32>
    %16 = arith.truncf %15 : vector<44x4xf32> to vector<44x4xbf16>
    %c0_10 = arith.constant 0 : index
    %c2 = arith.constant 2 : index
    %c0_11 = arith.constant 0 : index
    %c0_12 = arith.constant 0 : index
    %17 = vector.load %arg2[%c0_10, %c2, %c0_11, %c0_12] : memref<1x3x4x128xbf16, #tpu.memory_space<vmem>>, vector<1x1x4x128xbf16>
    %18 = vector.shape_cast %17 : vector<1x1x4x128xbf16> to vector<4x128xbf16>
    %cst_13 = arith.constant dense<0.000000e+00> : vector<44x128xf32>
    %19 = tpu.matmul %16, %18, %cst_13 {dimension_numbers = #tpu.dot_dimension_numbers<[1], [0], [0], [1], [0, 0, 1, 1], [], []>} : vector<44x4xbf16>, vector<4x128xbf16>, vector<44x128xf32> -> vector<44x128xf32>
    %20 = arith.addf %13, %19 : vector<44x128xf32>
    %c0_14 = arith.constant 0 : index
    %c0_15 = arith.constant 0 : index
    %c0_16 = arith.constant 0 : index
    %21 = vector.load %arg3[%c0_14, %c0_15, %c0_16] : memref<1x1x128xf32, #tpu.memory_space<vmem>>, vector<1x1x128xf32>
    %22 = vector.shape_cast %21 : vector<1x1x128xf32> to vector<1x128xf32>
    %23 = vector.broadcast %22 : vector<1x128xf32> to vector<44x128xf32>
    %24 = arith.addf %20, %23 : vector<44x128xf32>
    %25 = vector.shape_cast %24 : vector<44x128xf32> to vector<2x22x128xf32>
    %cst_17 = arith.constant 0.000000e+00 : f32
    %26 = vector.broadcast %cst_17 : f32 to vector<2x22x128xf32>
    %27 = arith.maximumf %25, %26 : vector<2x22x128xf32>
    %28 = vector.extract_strided_slice %27 {offsets = [0, 0, 0], sizes = [2, 20, 128], strides = [1, 1, 1]} : vector<2x22x128xf32> to vector<2x20x128xf32>
    %29 = vector.shape_cast %28 : vector<2x20x128xf32> to vector<40x128xf32>
    %30 = arith.truncf %29 : vector<40x128xf32> to vector<40x128xbf16>
    %c0_18 = arith.constant 0 : index
    %c0_19 = arith.constant 0 : index
    %c0_20 = arith.constant 0 : index
    %c0_21 = arith.constant 0 : index
    %31 = vector.load %arg4[%c0_18, %c0_19, %c0_20, %c0_21] : memref<1x3x128x128xbf16, #tpu.memory_space<vmem>>, vector<1x1x128x128xbf16>
    %32 = vector.shape_cast %31 : vector<1x1x128x128xbf16> to vector<128x128xbf16>
    %cst_22 = arith.constant dense<0.000000e+00> : vector<40x128xf32>
    %33 = tpu.matmul %30, %32, %cst_22 {dimension_numbers = #tpu.dot_dimension_numbers<[1], [0], [0], [1], [0, 0, 1, 1], [], []>} : vector<40x128xbf16>, vector<128x128xbf16>, vector<40x128xf32> -> vector<40x128xf32>
    %34 = vector.extract_strided_slice %27 {offsets = [0, 1, 0], sizes = [2, 20, 128], strides = [1, 1, 1]} : vector<2x22x128xf32> to vector<2x20x128xf32>
    %35 = vector.shape_cast %34 : vector<2x20x128xf32> to vector<40x128xf32>
    %36 = arith.truncf %35 : vector<40x128xf32> to vector<40x128xbf16>
    %c0_23 = arith.constant 0 : index
    %c1_24 = arith.constant 1 : index
    %c0_25 = arith.constant 0 : index
    %c0_26 = arith.constant 0 : index
    %37 = vector.load %arg4[%c0_23, %c1_24, %c0_25, %c0_26] : memref<1x3x128x128xbf16, #tpu.memory_space<vmem>>, vector<1x1x128x128xbf16>
    %38 = vector.shape_cast %37 : vector<1x1x128x128xbf16> to vector<128x128xbf16>
    %cst_27 = arith.constant dense<0.000000e+00> : vector<40x128xf32>
    %39 = tpu.matmul %36, %38, %cst_27 {dimension_numbers = #tpu.dot_dimension_numbers<[1], [0], [0], [1], [0, 0, 1, 1], [], []>} : vector<40x128xbf16>, vector<128x128xbf16>, vector<40x128xf32> -> vector<40x128xf32>
    %40 = arith.addf %33, %39 : vector<40x128xf32>
    %41 = vector.extract_strided_slice %27 {offsets = [0, 2, 0], sizes = [2, 20, 128], strides = [1, 1, 1]} : vector<2x22x128xf32> to vector<2x20x128xf32>
    %42 = vector.shape_cast %41 : vector<2x20x128xf32> to vector<40x128xf32>
    %43 = arith.truncf %42 : vector<40x128xf32> to vector<40x128xbf16>
    %c0_28 = arith.constant 0 : index
    %c2_29 = arith.constant 2 : index
    %c0_30 = arith.constant 0 : index
    %c0_31 = arith.constant 0 : index
    %44 = vector.load %arg4[%c0_28, %c2_29, %c0_30, %c0_31] : memref<1x3x128x128xbf16, #tpu.memory_space<vmem>>, vector<1x1x128x128xbf16>
    %45 = vector.shape_cast %44 : vector<1x1x128x128xbf16> to vector<128x128xbf16>
    %cst_32 = arith.constant dense<0.000000e+00> : vector<40x128xf32>
    %46 = tpu.matmul %43, %45, %cst_32 {dimension_numbers = #tpu.dot_dimension_numbers<[1], [0], [0], [1], [0, 0, 1, 1], [], []>} : vector<40x128xbf16>, vector<128x128xbf16>, vector<40x128xf32> -> vector<40x128xf32>
    %47 = arith.addf %40, %46 : vector<40x128xf32>
    %c0_33 = arith.constant 0 : index
    %c0_34 = arith.constant 0 : index
    %c0_35 = arith.constant 0 : index
    %48 = vector.load %arg5[%c0_33, %c0_34, %c0_35] : memref<1x1x128xf32, #tpu.memory_space<vmem>>, vector<1x1x128xf32>
    %49 = vector.shape_cast %48 : vector<1x1x128xf32> to vector<1x128xf32>
    %50 = vector.broadcast %49 : vector<1x128xf32> to vector<40x128xf32>
    %51 = arith.addf %47, %50 : vector<40x128xf32>
    %52 = vector.shape_cast %51 : vector<40x128xf32> to vector<2x20x128xf32>
    %cst_36 = arith.constant 0.000000e+00 : f32
    %53 = vector.broadcast %cst_36 : f32 to vector<2x20x128xf32>
    %54 = arith.maximumf %52, %53 : vector<2x20x128xf32>
    %55 = vector.shape_cast %54 : vector<2x20x128xf32> to vector<2x10x2x128xf32>
    %56 = vector.extract_strided_slice %55 {offsets = [0, 0, 0, 0], sizes = [2, 10, 1, 128], strides = [1, 1, 1, 1]} : vector<2x10x2x128xf32> to vector<2x10x1x128xf32>
    %57 = vector.shape_cast %56 : vector<2x10x1x128xf32> to vector<2x10x128xf32>
    %58 = vector.extract_strided_slice %55 {offsets = [0, 0, 1, 0], sizes = [2, 10, 1, 128], strides = [1, 1, 1, 1]} : vector<2x10x2x128xf32> to vector<2x10x1x128xf32>
    %59 = vector.shape_cast %58 : vector<2x10x1x128xf32> to vector<2x10x128xf32>
    %60 = arith.maximumf %57, %59 : vector<2x10x128xf32>
    %61 = vector.extract_strided_slice %60 {offsets = [0, 0, 0], sizes = [2, 8, 128], strides = [1, 1, 1]} : vector<2x10x128xf32> to vector<2x8x128xf32>
    %62 = vector.shape_cast %61 : vector<2x8x128xf32> to vector<16x128xf32>
    %63 = arith.truncf %62 : vector<16x128xf32> to vector<16x128xbf16>
    %c0_37 = arith.constant 0 : index
    %c0_38 = arith.constant 0 : index
    %c0_39 = arith.constant 0 : index
    %c0_40 = arith.constant 0 : index
    %64 = vector.load %arg6[%c0_37, %c0_38, %c0_39, %c0_40] : memref<1x3x128x128xbf16, #tpu.memory_space<vmem>>, vector<1x1x128x128xbf16>
    %65 = vector.shape_cast %64 : vector<1x1x128x128xbf16> to vector<128x128xbf16>
    %cst_41 = arith.constant dense<0.000000e+00> : vector<16x128xf32>
    %66 = tpu.matmul %63, %65, %cst_41 {dimension_numbers = #tpu.dot_dimension_numbers<[1], [0], [0], [1], [0, 0, 1, 1], [], []>} : vector<16x128xbf16>, vector<128x128xbf16>, vector<16x128xf32> -> vector<16x128xf32>
    %67 = vector.extract_strided_slice %60 {offsets = [0, 1, 0], sizes = [2, 8, 128], strides = [1, 1, 1]} : vector<2x10x128xf32> to vector<2x8x128xf32>
    %68 = vector.shape_cast %67 : vector<2x8x128xf32> to vector<16x128xf32>
    %69 = arith.truncf %68 : vector<16x128xf32> to vector<16x128xbf16>
    %c0_42 = arith.constant 0 : index
    %c1_43 = arith.constant 1 : index
    %c0_44 = arith.constant 0 : index
    %c0_45 = arith.constant 0 : index
    %70 = vector.load %arg6[%c0_42, %c1_43, %c0_44, %c0_45] : memref<1x3x128x128xbf16, #tpu.memory_space<vmem>>, vector<1x1x128x128xbf16>
    %71 = vector.shape_cast %70 : vector<1x1x128x128xbf16> to vector<128x128xbf16>
    %cst_46 = arith.constant dense<0.000000e+00> : vector<16x128xf32>
    %72 = tpu.matmul %69, %71, %cst_46 {dimension_numbers = #tpu.dot_dimension_numbers<[1], [0], [0], [1], [0, 0, 1, 1], [], []>} : vector<16x128xbf16>, vector<128x128xbf16>, vector<16x128xf32> -> vector<16x128xf32>
    %73 = arith.addf %66, %72 : vector<16x128xf32>
    %74 = vector.extract_strided_slice %60 {offsets = [0, 2, 0], sizes = [2, 8, 128], strides = [1, 1, 1]} : vector<2x10x128xf32> to vector<2x8x128xf32>
    %75 = vector.shape_cast %74 : vector<2x8x128xf32> to vector<16x128xf32>
    %76 = arith.truncf %75 : vector<16x128xf32> to vector<16x128xbf16>
    %c0_47 = arith.constant 0 : index
    %c2_48 = arith.constant 2 : index
    %c0_49 = arith.constant 0 : index
    %c0_50 = arith.constant 0 : index
    %77 = vector.load %arg6[%c0_47, %c2_48, %c0_49, %c0_50] : memref<1x3x128x128xbf16, #tpu.memory_space<vmem>>, vector<1x1x128x128xbf16>
    %78 = vector.shape_cast %77 : vector<1x1x128x128xbf16> to vector<128x128xbf16>
    %cst_51 = arith.constant dense<0.000000e+00> : vector<16x128xf32>
    %79 = tpu.matmul %76, %78, %cst_51 {dimension_numbers = #tpu.dot_dimension_numbers<[1], [0], [0], [1], [0, 0, 1, 1], [], []>} : vector<16x128xbf16>, vector<128x128xbf16>, vector<16x128xf32> -> vector<16x128xf32>
    %80 = arith.addf %73, %79 : vector<16x128xf32>
    %c0_52 = arith.constant 0 : index
    %c0_53 = arith.constant 0 : index
    %c0_54 = arith.constant 0 : index
    %81 = vector.load %arg7[%c0_52, %c0_53, %c0_54] : memref<1x1x128xf32, #tpu.memory_space<vmem>>, vector<1x1x128xf32>
    %82 = vector.shape_cast %81 : vector<1x1x128xf32> to vector<1x128xf32>
    %83 = vector.broadcast %82 : vector<1x128xf32> to vector<16x128xf32>
    %84 = arith.addf %80, %83 : vector<16x128xf32>
    %85 = vector.shape_cast %84 : vector<16x128xf32> to vector<2x8x128xf32>
    %cst_55 = arith.constant 0.000000e+00 : f32
    %86 = vector.broadcast %cst_55 : f32 to vector<2x8x128xf32>
    %87 = arith.maximumf %85, %86 : vector<2x8x128xf32>
    %88 = vector.extract_strided_slice %87 {offsets = [0, 0, 0], sizes = [2, 6, 128], strides = [1, 1, 1]} : vector<2x8x128xf32> to vector<2x6x128xf32>
    %89 = vector.shape_cast %88 : vector<2x6x128xf32> to vector<12x128xf32>
    %90 = arith.truncf %89 : vector<12x128xf32> to vector<12x128xbf16>
    %c0_56 = arith.constant 0 : index
    %c0_57 = arith.constant 0 : index
    %c0_58 = arith.constant 0 : index
    %c0_59 = arith.constant 0 : index
    %91 = vector.load %arg8[%c0_56, %c0_57, %c0_58, %c0_59] : memref<1x3x128x64xbf16, #tpu.memory_space<vmem>>, vector<1x1x128x64xbf16>
    %92 = vector.shape_cast %91 : vector<1x1x128x64xbf16> to vector<128x64xbf16>
    %cst_60 = arith.constant dense<0.000000e+00> : vector<12x64xf32>
    %93 = tpu.matmul %90, %92, %cst_60 {dimension_numbers = #tpu.dot_dimension_numbers<[1], [0], [0], [1], [0, 0, 1, 1], [], []>} : vector<12x128xbf16>, vector<128x64xbf16>, vector<12x64xf32> -> vector<12x64xf32>
    %94 = vector.extract_strided_slice %87 {offsets = [0, 1, 0], sizes = [2, 6, 128], strides = [1, 1, 1]} : vector<2x8x128xf32> to vector<2x6x128xf32>
    %95 = vector.shape_cast %94 : vector<2x6x128xf32> to vector<12x128xf32>
    %96 = arith.truncf %95 : vector<12x128xf32> to vector<12x128xbf16>
    %c0_61 = arith.constant 0 : index
    %c1_62 = arith.constant 1 : index
    %c0_63 = arith.constant 0 : index
    %c0_64 = arith.constant 0 : index
    %97 = vector.load %arg8[%c0_61, %c1_62, %c0_63, %c0_64] : memref<1x3x128x64xbf16, #tpu.memory_space<vmem>>, vector<1x1x128x64xbf16>
    %98 = vector.shape_cast %97 : vector<1x1x128x64xbf16> to vector<128x64xbf16>
    %cst_65 = arith.constant dense<0.000000e+00> : vector<12x64xf32>
    %99 = tpu.matmul %96, %98, %cst_65 {dimension_numbers = #tpu.dot_dimension_numbers<[1], [0], [0], [1], [0, 0, 1, 1], [], []>} : vector<12x128xbf16>, vector<128x64xbf16>, vector<12x64xf32> -> vector<12x64xf32>
    %100 = arith.addf %93, %99 : vector<12x64xf32>
    %101 = vector.extract_strided_slice %87 {offsets = [0, 2, 0], sizes = [2, 6, 128], strides = [1, 1, 1]} : vector<2x8x128xf32> to vector<2x6x128xf32>
    %102 = vector.shape_cast %101 : vector<2x6x128xf32> to vector<12x128xf32>
    %103 = arith.truncf %102 : vector<12x128xf32> to vector<12x128xbf16>
    %c0_66 = arith.constant 0 : index
    %c2_67 = arith.constant 2 : index
    %c0_68 = arith.constant 0 : index
    %c0_69 = arith.constant 0 : index
    %104 = vector.load %arg8[%c0_66, %c2_67, %c0_68, %c0_69] : memref<1x3x128x64xbf16, #tpu.memory_space<vmem>>, vector<1x1x128x64xbf16>
    %105 = vector.shape_cast %104 : vector<1x1x128x64xbf16> to vector<128x64xbf16>
    %cst_70 = arith.constant dense<0.000000e+00> : vector<12x64xf32>
    %106 = tpu.matmul %103, %105, %cst_70 {dimension_numbers = #tpu.dot_dimension_numbers<[1], [0], [0], [1], [0, 0, 1, 1], [], []>} : vector<12x128xbf16>, vector<128x64xbf16>, vector<12x64xf32> -> vector<12x64xf32>
    %107 = arith.addf %100, %106 : vector<12x64xf32>
    %c0_71 = arith.constant 0 : index
    %c0_72 = arith.constant 0 : index
    %c0_73 = arith.constant 0 : index
    %108 = vector.load %arg9[%c0_71, %c0_72, %c0_73] : memref<1x1x64xf32, #tpu.memory_space<vmem>>, vector<1x1x64xf32>
    %109 = vector.shape_cast %108 : vector<1x1x64xf32> to vector<1x64xf32>
    %110 = vector.broadcast %109 : vector<1x64xf32> to vector<12x64xf32>
    %111 = arith.addf %107, %110 : vector<12x64xf32>
    %112 = vector.shape_cast %111 : vector<12x64xf32> to vector<2x6x64xf32>
    %cst_74 = arith.constant 0.000000e+00 : f32
    %113 = vector.broadcast %cst_74 : f32 to vector<2x6x64xf32>
    %114 = arith.maximumf %112, %113 : vector<2x6x64xf32>
    %115 = vector.shape_cast %114 : vector<2x6x64xf32> to vector<2x3x2x64xf32>
    %116 = vector.extract_strided_slice %115 {offsets = [0, 0, 0, 0], sizes = [2, 3, 1, 64], strides = [1, 1, 1, 1]} : vector<2x3x2x64xf32> to vector<2x3x1x64xf32>
    %117 = vector.shape_cast %116 : vector<2x3x1x64xf32> to vector<2x3x64xf32>
    %118 = vector.extract_strided_slice %115 {offsets = [0, 0, 1, 0], sizes = [2, 3, 1, 64], strides = [1, 1, 1, 1]} : vector<2x3x2x64xf32> to vector<2x3x1x64xf32>
    %119 = vector.shape_cast %118 : vector<2x3x1x64xf32> to vector<2x3x64xf32>
    %120 = arith.maximumf %117, %119 : vector<2x3x64xf32>
    %121 = vector.shape_cast %120 : vector<2x3x64xf32> to vector<2x192xf32>
    %122 = arith.truncf %121 : vector<2x192xf32> to vector<2x192xbf16>
    %c0_75 = arith.constant 0 : index
    %c0_76 = arith.constant 0 : index
    %c0_77 = arith.constant 0 : index
    %123 = vector.load %arg10[%c0_75, %c0_76, %c0_77] : memref<1x192x256xbf16, #tpu.memory_space<vmem>>, vector<1x192x256xbf16>
    %124 = vector.shape_cast %123 : vector<1x192x256xbf16> to vector<192x256xbf16>
    %cst_78 = arith.constant dense<0.000000e+00> : vector<2x256xf32>
    %125 = tpu.matmul %122, %124, %cst_78 {dimension_numbers = #tpu.dot_dimension_numbers<[1], [0], [0], [1], [0, 0, 1, 1], [], []>} : vector<2x192xbf16>, vector<192x256xbf16>, vector<2x256xf32> -> vector<2x256xf32>
    %c0_79 = arith.constant 0 : index
    %c0_80 = arith.constant 0 : index
    %c0_81 = arith.constant 0 : index
    %126 = vector.load %arg11[%c0_79, %c0_80, %c0_81] : memref<1x1x256xf32, #tpu.memory_space<vmem>>, vector<1x1x256xf32>
    %127 = vector.shape_cast %126 : vector<1x1x256xf32> to vector<1x256xf32>
    %128 = vector.broadcast %127 : vector<1x256xf32> to vector<2x256xf32>
    %129 = arith.addf %125, %128 : vector<2x256xf32>
    %cst_82 = arith.constant 0.000000e+00 : f32
    %130 = vector.broadcast %cst_82 : f32 to vector<2x256xf32>
    %131 = arith.maximumf %129, %130 : vector<2x256xf32>
    %132 = arith.truncf %131 : vector<2x256xf32> to vector<2x256xbf16>
    %c0_83 = arith.constant 0 : index
    %c0_84 = arith.constant 0 : index
    %c0_85 = arith.constant 0 : index
    %133 = vector.load %arg12[%c0_83, %c0_84, %c0_85] : memref<1x256x1xbf16, #tpu.memory_space<vmem>>, vector<1x256x1xbf16>
    %134 = vector.shape_cast %133 : vector<1x256x1xbf16> to vector<256x1xbf16>
    %cst_86 = arith.constant dense<0.000000e+00> : vector<2x1xf32>
    %135 = tpu.matmul %132, %134, %cst_86 {dimension_numbers = #tpu.dot_dimension_numbers<[1], [0], [0], [1], [0, 0, 1, 1], [], []>} : vector<2x256xbf16>, vector<256x1xbf16>, vector<2x1xf32> -> vector<2x1xf32>
    %c0_87 = arith.constant 0 : index
    %c0_88 = arith.constant 0 : index
    %c0_89 = arith.constant 0 : index
    %136 = vector.load %arg13[%c0_87, %c0_88, %c0_89] : memref<1x1x1xf32, #tpu.memory_space<vmem>>, vector<1x1x1xf32>
    %137 = vector.shape_cast %136 : vector<1x1x1xf32> to vector<1x1xf32>
    %138 = vector.broadcast %137 : vector<1x1xf32> to vector<2x1xf32>
    %139 = arith.addf %135, %138 : vector<2x1xf32>
    %cst_90 = arith.constant 0.000000e+00 : f32
    %140 = vector.broadcast %cst_90 : f32 to vector<2x1xf32>
    %141 = arith.subf %140, %139 : vector<2x1xf32>
    %142 = math.exp %141 : vector<2x1xf32>
    %cst_91 = arith.constant 1.000000e+00 : f32
    %143 = vector.broadcast %cst_91 : f32 to vector<2x1xf32>
    %144 = arith.addf %143, %142 : vector<2x1xf32>
    %145 = tpu.reciprocal %144 {approx = true} : vector<2x1xf32> -> vector<2x1xf32>
    %146 = vector.shape_cast %145 : vector<2x1xf32> to vector<1x2x1xf32>
    %c0_92 = arith.constant 0 : index
    %c0_93 = arith.constant 0 : index
    %c0_94 = arith.constant 0 : index
    %147 = vector.load %arg14[%c0_92, %c0_93, %c0_94] : memref<1x2x1xf32, #tpu.memory_space<vmem>>, vector<1x2x1xf32>
    tpu.vector_store %arg14[%c0_92, %c0_93, %c0_94], %146 {strides = array<i32>} : memref<1x2x1xf32, #tpu.memory_space<vmem>>, vector<1x2x1xf32>,
    return
  }
  func.func @transform_0(%arg0: i32) -> (i32, i32, i32) {
    %c0_i32 = arith.constant 0 : i32
    %c0_i32_0 = arith.constant 0 : i32
    %c0_i32_1 = arith.constant 0 : i32
    %c0_i32_2 = arith.constant 0 : i32
    return %c0_i32, %c0_i32_0, %c0_i32_1 : i32, i32, i32
  }
  func.func @transform_1(%arg0: i32) -> (i32, i32, i32, i32) {
    %c0_i32 = arith.constant 0 : i32
    %c0_i32_0 = arith.constant 0 : i32
    %c0_i32_1 = arith.constant 0 : i32
    %c0_i32_2 = arith.constant 0 : i32
    return %arg0, %c0_i32, %c0_i32_0, %c0_i32_1 : i32, i32, i32, i32
  }
  func.func @transform_2(%arg0: i32) -> (i32, i32, i32) {
    %c0_i32 = arith.constant 0 : i32
    %c0_i32_0 = arith.constant 0 : i32
    %c0_i32_1 = arith.constant 0 : i32
    return %arg0, %c0_i32, %c0_i32_0 : i32, i32, i32
  }
  func.func @transform_3(%arg0: i32) -> (i32, i32, i32, i32) {
    %c0_i32 = arith.constant 0 : i32
    %c0_i32_0 = arith.constant 0 : i32
    %c0_i32_1 = arith.constant 0 : i32
    %c0_i32_2 = arith.constant 0 : i32
    return %arg0, %c0_i32, %c0_i32_0, %c0_i32_1 : i32, i32, i32, i32
  }
  func.func @transform_4(%arg0: i32) -> (i32, i32, i32) {
    %c0_i32 = arith.constant 0 : i32
    %c0_i32_0 = arith.constant 0 : i32
    %c0_i32_1 = arith.constant 0 : i32
    return %arg0, %c0_i32, %c0_i32_0 : i32, i32, i32
  }
  func.func @transform_5(%arg0: i32) -> (i32, i32, i32, i32) {
    %c0_i32 = arith.constant 0 : i32
    %c0_i32_0 = arith.constant 0 : i32
    %c0_i32_1 = arith.constant 0 : i32
    %c0_i32_2 = arith.constant 0 : i32
    return %arg0, %c0_i32, %c0_i32_0, %c0_i32_1 : i32, i32, i32, i32
  }
  func.func @transform_6(%arg0: i32) -> (i32, i32, i32) {
    %c0_i32 = arith.constant 0 : i32
    %c0_i32_0 = arith.constant 0 : i32
    %c0_i32_1 = arith.constant 0 : i32
    return %arg0, %c0_i32, %c0_i32_0 : i32, i32, i32
  }
  func.func @transform_7(%arg0: i32) -> (i32, i32, i32, i32) {
    %c0_i32 = arith.constant 0 : i32
    %c0_i32_0 = arith.constant 0 : i32
    %c0_i32_1 = arith.constant 0 : i32
    %c0_i32_2 = arith.constant 0 : i32
    return %arg0, %c0_i32, %c0_i32_0, %c0_i32_1 : i32, i32, i32, i32
  }
  func.func @transform_8(%arg0: i32) -> (i32, i32, i32) {
    %c0_i32 = arith.constant 0 : i32
    %c0_i32_0 = arith.constant 0 : i32
    %c0_i32_1 = arith.constant 0 : i32
    return %arg0, %c0_i32, %c0_i32_0 : i32, i32, i32
  }
  func.func @transform_9(%arg0: i32) -> (i32, i32, i32) {
    %c0_i32 = arith.constant 0 : i32
    %c0_i32_0 = arith.constant 0 : i32
    %c0_i32_1 = arith.constant 0 : i32
    return %arg0, %c0_i32, %c0_i32_0 : i32, i32, i32
  }
  func.func @transform_10(%arg0: i32) -> (i32, i32, i32) {
    %c0_i32 = arith.constant 0 : i32
    %c0_i32_0 = arith.constant 0 : i32
    %c0_i32_1 = arith.constant 0 : i32
    return %arg0, %c0_i32, %c0_i32_0 : i32, i32, i32
  }
  func.func @transform_11(%arg0: i32) -> (i32, i32, i32) {
    %c0_i32 = arith.constant 0 : i32
    %c0_i32_0 = arith.constant 0 : i32
    %c0_i32_1 = arith.constant 0 : i32
    return %arg0, %c0_i32, %c0_i32_0 : i32, i32, i32
  }
  func.func @transform_12(%arg0: i32) -> (i32, i32, i32) {
    %c0_i32 = arith.constant 0 : i32
    %c0_i32_0 = arith.constant 0 : i32
    %c0_i32_1 = arith.constant 0 : i32
    return %arg0, %c0_i32, %c0_i32_0 : i32, i32, i32
  }
  func.func @transform_13(%arg0: i32) -> (i32, i32, i32) {
    %c0_i32 = arith.constant 0 : i32
    %c0_i32_0 = arith.constant 0 : i32
    %c0_i32_1 = arith.constant 0 : i32
    return %arg0, %c0_i32, %c0_i32_0 : i32, i32, i32
  }
}

</mosaic_0001>

<bundles_post_ra>
// kernel: tpu_custom_call.1
= control target key start
LH: loop header
LB: loop body
LE: loop exit
PB: predicated region body
PF: predicated region fallthrough
CT: control target
= control target key end

     0   :  { %18 = vsyncpa [#allocation3], 0  ;;  %s6192_s0 = inlined_call_operand.vmem [shape: f32[2,24,4], index: 0, kind: input, shape index: {}]   ;;  %s6193_s1 = inlined_call_operand.vmem [shape: bf16[3,3,4,128], index: 1, kind: input, shape index: {}]   ;;  %s6194_s2 = inlined_call_operand.vmem [shape: f32[3,1,128], index: 2, kind: input, shape index: {}]   ;;  %s6195_s3 = inlined_call_operand.vmem [shape: bf16[3,3,128,128], index: 3, kind: input, shape index: {}]   ;;  %s6196_s4 = inlined_call_operand.vmem [shape: f32[3,1,128], index: 4, kind: input, shape index: {}]   ;;  %s6197_s5 = inlined_call_operand.vmem [shape: bf16[3,3,128,128], index: 5, kind: input, shape index: {}]   ;;  %s6198_s6 = inlined_call_operand.vmem [shape: f32[3,1,128], index: 6, kind: input, shape index: {}]   ;;  %s6199_s7 = inlined_call_operand.vmem [shape: bf16[3,3,128,64], index: 7, kind: input, shape index: {}]   ;;  %s6200_s8 = inlined_call_operand.vmem [shape: f32[3,1,64], index: 8, kind: input, shape index: {}]   ;;  %s6201_s9 = inlined_call_operand.hbm [shape: bf16[3,192,256], index: 9, kind: input, shape index: {}]   ;;  %s6202_s10 = inlined_call_operand.vmem [shape: f32[3,1,256], index: 10, kind: input, shape index: {}]   ;;  %s6203_s11 = inlined_call_operand.vmem [shape: bf16[3,256,1], index: 11, kind: input, shape index: {}]   ;;  %s6204_s12 = inlined_call_operand.vmem [shape: f32[3,1,1], index: 12, kind: input, shape index: {}]   ;;  %s6205_s13 = inlined_call_operand.vmem [shape: f32[3,2,1], index: 13, kind: output, shape index: {}]  }
   0x1   :  { %20 = vsyncpa [#allocation3 + $0x1], 0  ;;  %s5093_s25 = smov 0   ;;  %s5095_s26 = smov 0  }
   0x2   :  { %s5097_s27 = smov 0   ;;  %s5099_s28 = smov 0  }
   0x3 LB: > { %6210 = sst [smem:[#allocation5_spill]] %s5009_s27  ;;  %s5112_s29 = sadd.s32 4294967295, %s5013_s28   ;;  %s5013_s28 = sphi %s5099_s28, %s6221_s28   ;;  %s5009_s27 = sphi %s5097_s27, %s6223_s27   ;;  %s5005_s26 = sphi %s5095_s26, %s6225_s26   ;;  %s5001_s25 = sphi %s5093_s25, %s6224_s25  }
   0x4   : > { %s5115_s30 = sadd.s32 1, %s5013_s28   ;;  %s262_s15 = sadd.s32 1, %s5009_s27 }
   0x5   : > { %6211 = sst [smem:[#allocation6_spill]] %s5115_s30  ;;  %s259_s14 = ssub.s32 %s5013_s28, %s5115_s30 }
   0x6   : > { %p260_p0 = scmp.eq.s32.totalorder %s259_s14, 0  ;;  %p269_p1 = scmp.ne.s32.totalorder %s5009_s27, %s5005_s26 }
   0x7   : > { %p270_p2 = scmp.eq.s32.totalorder %s5013_s28, 0  ;;  %p275_p3 = scmp.ne.s32.totalorder %s5005_s26, %s5001_s25 }
   0x8   : > { %s5125_s16 = scalar_select %p260_p0, %s5009_s27, %s262_s15  }
   0x9   : > { %p271_p4 = por %p270_p2, %p269_p1  ;;  %p276_p5 = scmp.eq.s32.totalorder %s5112_s29, 0 }
   0xa   : > { %6212 = sst [smem:[#allocation7_spill]] %s5125_s16  ;;  %p4777_p6 = scmp.lt.s32.totalorder %s5013_s28, 3 }
   0xb   : > { %p5129_p7 = por %p276_p5, %p275_p3  ;;  %s462_s18 = sand.u32 1, %s5009_s27  }
   0xc   : > { %s4766_s19 = smul.u32 192, %s462_s18  ;;  %p5135_p8 = pnand %p4777_p6, %p271_p4 }
   0xd   : > { %s6213_s17 = scalar_select %p5129_p7, 1, 0 }
   0xe   : > { %s4767_s20 = smul.u32 3072, %s5013_s28  ;;  %s466_s25 = scalar_lea.vmem [#allocation2], %s4766_s19 }
   0xf   : > { %s473_s14 = sshll.u32 %s466_s25, 4  ;;  %s5147_s15 = scalar_lea.sflag [#allocation3], %s462_s18  ;;  %s5144_s14 = int_to_ptr.vmem [resolvable:$true] %s473_s14 }
  0x10   : > { %s5142_s24 = scalar_lea.hbm %s6201_s9, %s4767_s20  ;;  %p4953_p11 = pneg %p5135_p8 }
  0x11   : > { %s4951_s16 = scalar_lea.hbm %s5142_s24, 3072  ;;  %s4956_s20 = scalar_lea.hbm %s6201_s9, 9216 }
  0x12   : > { %p4952_p10 = scmp.ne.s32.totalorder %s5142_s24, %s4951_s16  ;;  %p4957_p0 = scmp.lt.s32.totalorder %s5142_s24, %s6201_s9 }
  0x13   : > { %p4958_p1 = scmp.lt.s32.totalorder %s4956_s20, %s4951_s16 }
  0x14   : > { %p4954_p12 = pnand %p4953_p11, %p4952_p10 }
  0x15   : > { %p4959_p2 = por %p4958_p1, %p4957_p0 }
  0x16   : > { %p4955_p13 = pneg %p4954_p12 }
  0x18   : > { %p4960_p3 = pnand %p4959_p2, %p4955_p13 }
  0x1a   : > { %4963 = shalt.err (!%p4960_p3)
}
  0x1b   : > { %s4964_s18 = scalar_lea.vmem %s5144_s14, 3072  ;;  %s5015_s19 = smov [#allocation2]  }
  0x1c   : > { %p4965_p4 = scmp.ne.s32.totalorder %s5144_s14, %s4964_s18  ;;  %s4969_s25 = sshll.u32 %s5015_s19, 4  ;;  %s4970_s25 = int_to_ptr.vmem [resolvable:$false] %s4969_s25 }
  0x1d   : > { %s4971_s22 = scalar_lea.vmem %s4970_s25, 6144  ;;  %p4972_p10 = scmp.lt.s32.totalorder %s5144_s14, %s4970_s25 }
  0x1e   : > { %p4967_p5 = pnand %p4965_p4, %p4953_p11  ;;  %p4973_p12 = scmp.lt.s32.totalorder %s4971_s22, %s4964_s18 }
  0x20   : > { %p4968_p6 = pneg %p4967_p5  ;;  %p4974_p9 = por %p4973_p12, %p4972_p10 }
  0x22   : > { %p4975_p7 = pnand %p4974_p9, %p4968_p6 }
  0x24   : > { %4978 = shalt.err (!%p4975_p7)
}
  0x25   : > { %s5016_s27 = smov 128   ;;  %s5017_s30 = smov 8  }
  0x26   : > { %4776 = dma.hbm_to_vmem [thread:$0]  (!%p5135_p8), %s5142_s24, 3072, %s5144_s14, %s5147_s15, %s5016_s27, %s5016_s27, %s5017_s30  }
  0x27   : > { %p502_p11 = scmp.lt.s32.totalorder %s5013_s28, 4  ;;  %p6215_p13 = scmp.ge.s32.totalorder %s5013_s28, 1 }
  0x29   : > { %p503_p0 = pnand %p6215_p13, %p502_p11 }
  0x2a   : > { %s508_s16 = sand.u32 (!%p503_p0), 1, %s5005_s26   ;;  %p6216_p7 = scmp.ne.s32.totalorder (!%p503_p0), %s6213_s17, 0 }
  0x2b   : > { %506 = sbr.rel (%p503_p0) target bundleno = 1685 (0x695), region = 72  ;;  %s509_s20 = scalar_lea.sflag (!%p503_p0), [#allocation3], %s508_s16 }
  0x2c   : > { %s4768_s23 = smul.u32 (!%p503_p0), 192, %s508_s16 }
  0x2e   : > { %s5172_s18 = scalar_lea.vmem (!%p503_p0), [#allocation2], %s4768_s23 }
  0x30   : > { %4996 = dma.done.wait (%p6216_p7), %s509_s20, 3072  }
  0x31   : > { %4998 = vsyncadd (%p6216_p7), %s509_s20, 4294964224  ;;  %p598_p9 = scmp.lt.s32.totalorder %s5112_s29, 2  ;;  %v663_v0 = vlaneseq  ;;  %v5018_v1 = vmov 0.0   ;;  %vm864_vm0 = vcmask 1040384   ;;  %vm865_vm1 = vcmask 1042434   ;;  %v647_v10 = vld [vmem:[%s6192_s0] sm:$0xff] }
  0x32   : > { %4520 = vmatprep.subr.bf16.mxu0 %v5018_v1  ;;  %4534 = vmatprep.subr.bf16.mxu1 %v5018_v1  ;;  %vm5019_vm2 = vmmov 0   ;;  %v5020_v2 = vmov 1983009808   ;;  %vm866_vm3 = vmor %vm864_vm0, %vm865_vm1  ;;  %vm867_vm4 = vcmask 1044484   ;;  %vm1053_vm5 = vcmask 1041408   ;;  %v648_v13 = vld [vmem:[%s6192_s0 + $0x8] sm:$0xff] }
  0x33   : > { %s6227_s29 = smov (!%p598_p9, %s5112_s29), 2  ;;  %4522 = vmatprep.mubr.msk.bf16.mxu0 %vm5019_vm2, %v5018_v1  ;;  %4536 = vmatprep.mubr.msk.bf16.mxu1 %vm5019_vm2, %v5018_v1  ;;  %v661_v3 = vunpack.c.l.s4 %v5020_v2  ;;  %v5188_v4 = vshrl.u32 %v663_v0, 7  ;;  %vm5202_vm6 = vmor %vm866_vm3, %vm867_vm4  ;;  %vm869_vm7 = vcmask 1046534   ;;  %v649_v14 = vld [vmem:[%s6192_s0 + $0x10] sm:$0xff]  ;;  %v659_v15 = vcombine.high %v647_v10, %v647_v10  ;;  %v650_v51 = vld [vmem:[%s6192_s0 + $0x18] sm:$0xff] }
  0x34   : > { %s4769_s28 = smul.u32 6, %s6227_s29  ;;  %v676_v18 = vcombine.high %v648_v13, %v648_v13  ;;  %v693_v20 = vcombine.high %v649_v14, %v649_v14  ;;  %vm5231_vm8 = vmor %vm5202_vm6, %vm869_vm7  ;;  %vm1043_vm9 = vcmask 31744   ;;  %v5298_v60 = vld [vmem:[%s6192_s0 + $0x20] sm:$0xff]  ;;  %s605_s19 = scalar_lea.vmem %s6194_s2, %s6227_s29  ;;  %vm2559_vm10 = vcmask 1041409  }
  0x35   : > { %v662_v5 = vunpack.c.0.s8 %v661_v3  ;;  %s5193_s17 = smul.u32 192, %s6227_s29  ;;  %s613_s22 = scalar_lea.vmem %s6196_s4, %s6227_s29  ;;  %vm2564_vm11 = vcmask 1043459   ;;  %vm2569_vm12 = vcmask 1045509   ;;  %vm2574_vm13 = vcmask 1047559  }
  0x36   : > { %s602_s14 = scalar_lea.vmem %s6193_s1, %s4769_s28  ;;  %s4398_s28 = sshll.u32 %s6227_s29, 7  ;;  %vm3552_vm14 = vcmask 523264   ;;  %vm3940_vm15 = vcmask 1024  }
  0x37   : > { %v5199_v6 = vsub.s32 %v662_v5, %v5188_v4  ;;  %v4139_v8 = vld [vmem:[%s602_s14 + $0x2] sm:$0x3]  ;;  %v861_v9 = vld [vmem:[%s602_s14] sm:$0x3]  ;;  %v4147_v17 = vld [vmem:[%s602_s14 + $0x4] sm:$0x3]  ;;  %s5222_s20 = scalar_lea.vmem %s6195_s3, %s5193_s17  ;;  %s5375_s30 = scalar_lea.vmem %s6197_s5, %s5193_s17 }
  0x38   : > { %v1055_v11 = vsel %vm1053_vm5, %v4139_v8, 0  ;;  %v1124_v12 = vsel %vm1053_vm5, %v861_v9, 0  ;;  %v5236_v22 = vsel %vm1053_vm5, %v4147_v17, 0  ;;  %s5470_s21 = scalar_lea.vmem %s6199_s7, %s5193_s17  ;;  %s5505_s14 = scalar_lea.vmem %s6203_s11, %s4398_s28 }
  0x39   : > { %v666_v16 = vrot.slane %v647_v10, %v5199_v6  ;;  %4521 = vmatpush3.bf16.msra.mxu0 %v1055_v11  ;;  %4535 = vmatpush3.bf16.msra.mxu1 %v1124_v12  ;;  %v5226_v19 = vrot.slane %v648_v13, %v5199_v6  ;;  %v5240_v23 = vrot.slane %v659_v15, %v5199_v6  ;;  %s621_s16 = scalar_lea.vmem %s6198_s6, %s6227_s29  ;;  %v4889_v21 = vld [vmem:[%s5470_s21 + $0xa8] sm:$0xff]   ;;  %s629_s17 = scalar_lea.vmem %s6200_s8, %s6227_s29 }
  0x3a   : > { %4548 = vmatprep.subr.bf16.mxu0 %v5018_v1  ;;  %v5245_v25 = vrot.slane %v649_v14, %v5199_v6  ;;  %4562 = vmatprep.subr.bf16.mxu1 %v5018_v1  ;;  %v5249_v27 = vrot.slane %v676_v18, %v5199_v6  ;;  %v5256_v29 = vrot.slane %v693_v20, %v5199_v6  ;;  %s4133_s24 = sshll.u32 %s6227_s29, 1  ;;  %s641_s25 = scalar_lea.vmem %s6204_s12, %s6227_s29 }
  0x3b   : > { %v5242_v24 = vcombine.high %v666_v16, %v666_v16  ;;  %v4137_v26 = vrot.slane %v666_v16, 9  ;;  %v5253_v28 = vcombine.high %v5226_v19, %v5226_v19  ;;  %v882_v30 = vrot.slane %v5226_v19, 7 }
  0x3c   : > { %v5261_v31 = vcombine.high %v5240_v23, %v5240_v23  ;;  %v876_v33 = vrot.slane %v5240_v23, 7  ;;  %v894_v34 = vrot.slane %v5245_v25, 7  ;;  %v5268_v35 = vcombine.high %v5249_v27, %v5249_v27 }
  0x3d   : > { %v873_v32 = vrot.slane %v5242_v24, 7  ;;  %v884_v36 = vrot.slane %v882_v30, 2  ;;  %v885_v37 = vrot.slane %v5253_v28, 7  ;;  %v888_v38 = vrot.slane %v5249_v27, 7 }
  0x3e   : > { %v878_v41 = vrot.slane %v876_v33, 2  ;;  %v879_v42 = vrot.slane %v5261_v31, 7  ;;  %v891_v46 = vrot.slane %v5268_v35, 7  ;;  %v759_v50 = vcombine.low %v666_v16, %v5242_v24 }
  0x3f   : > { %v874_v39 = vsel %vm5231_vm8, %v4137_v26, %v873_v32  ;;  %v875_v40 = vrot.slane %v873_v32, 2  ;;  %v886_v43 = vsel %vm5231_vm8, %v884_v36, %v885_v37  ;;  %v887_v44 = vrot.slane %v885_v37, 2 }
  0x40   : > { %v890_v45 = vrot.slane %v888_v38, 2  ;;  %v880_v48 = vsel %vm5231_vm8, %v878_v41, %v879_v42  ;;  %v881_v49 = vrot.slane %v879_v42, 2  ;;  %v893_v54 = vrot.slane %v891_v46, 2 }
  0x41   : > { %v877_v47 = vsel %vm5231_vm8, %v875_v40, %v876_v33  ;;  %v889_v52 = vsel %vm5231_vm8, %v887_v44, %v888_v38  ;;  %v760_v58 = vcombine.low %v5240_v23, %v5261_v31  ;;  %v767_v59 = vrot.slane %v759_v50, %v5199_v6 }
  0x42   : > { %v892_v53 = vsel %vm5231_vm8, %v890_v45, %v891_v46  ;;  %v939_v55 = vcombine.low %v874_v39, %v877_v47  ;;  %v883_v56 = vsel %vm5231_vm8, %v881_v49, %v882_v30  ;;  %v956_v57 = vcombine.low %v886_v43, %v889_v52 }
  0x43   : > { %v895_v61 = vsel %vm5231_vm8, %v893_v54, %v894_v34  ;;  %v940_v62 = vcombine.low %v880_v48, %v883_v56  ;;  %v776_v0 = vcombine.low %v5226_v19, %v5253_v28  ;;  %v774_v5 = vrot.slane %v760_v58, %v5199_v6  ;;  %v652_v58 = vld [vmem:[%s6192_s0 + $0x28] sm:$0xff] }
  0x44   : > { %v947_v63 = vrot.slane %v939_v55, %v5199_v6  ;;  %v957_v2 = vcombine.low %v892_v53, %v895_v61  ;;  %v964_v3 = vrot.slane %v956_v57, %v5199_v6  ;;  %v777_v7 = vcombine.low %v5249_v27, %v5268_v35 }
  0x45   : > { %v954_v8 = vrot.slane %v940_v62, %v5199_v6  ;;  %v784_v9 = vrot.slane %v776_v0, %v5199_v6  ;;  %v5313_v10 = vcombine.high %v5245_v25, %v5245_v25  ;;  %v709_v11 = vcombine.high %v650_v51, %v650_v51 }
  0x46   : > { %v971_v12 = vrot.slane %v957_v2, %v5199_v6  ;;  %v775_v13 = vcombine.low %v767_v59, %v774_v5  ;;  %v791_v14 = vrot.slane %v777_v7, %v5199_v6  ;;  %v5318_v15 = vrot.slane %v650_v51, %v5199_v6 }
  0x47   : > { %v955_v16 = vcombine.low %v947_v63, %v954_v8  ;;  %v5321_v17 = vrot.slane %v709_v11, %v5199_v6  ;;  %v5325_v18 = vrot.slane %v5298_v60, %v5199_v6  ;;  %v862_v20 = vcombine.high %v5256_v29, %v5256_v29 }
  0x48   : > { %v972_v26 = vcombine.low %v964_v3, %v971_v12  ;;  %v792_v30 = vcombine.low %v784_v9, %v791_v14  ;;  %v724_v32 = vcombine.high %v5318_v15, %v5318_v15  ;;  %v896_v33 = vrot.slane %v894_v34, 2 }
  0x49   : > { %v5333_v36 = vcombine.high %v5321_v17, %v5321_v17  ;;  %v5337_v37 = vcombine.high %v5325_v18, %v5325_v18  ;;  %v897_v38 = vrot.slane %v5313_v10, 7  ;;  %v900_v39 = vrot.slane %v5256_v29, 7 }
  0x4a   : > { %v1038_v40 = vpack.c.bf16 %v972_v26, %v955_v16  ;;  %v858_v41 = vpack.c.bf16 %v792_v30, %v775_v13  ;;  %v903_v42 = vrot.slane %v862_v20, 7  ;;  %v4138_v43 = vrot.slane %v5318_v15, 9 }
  0x4b   : > { %v898_v34 = vsel %vm5231_vm8, %v896_v33, %v897_v38  ;;  %v899_v44 = vrot.slane %v897_v38, 2  ;;  %v902_v45 = vrot.slane %v900_v39, 2  ;;  %v907_v46 = vrot.slane %v724_v32, 7 }
  0x4c   : > { %4523 = vmatmul.mubr.msk.bf16.vlgmr.msra.gmra.mxu0 %vm1043_vm9, %v1038_v40  ;;  %4537 = vmatmul.mubr.msk.bf16.vlgmr.msra.gmra.mxu1 %vm1043_vm9, %v858_v41  ;;  %v910_v47 = vrot.slane %v5321_v17, 7  ;;  %v913_v48 = vrot.slane %v5333_v36, 7  ;;  %v916_v49 = vrot.slane %v5325_v18, 7  ;;  %v919_v50 = vrot.slane %v5337_v37, 7 }
  0x4d   : > { %4549 = vmatpush3.bf16.msra.mxu0 %v5236_v22  ;;  %4526 = vmatprep.mubr.msk.bf16.mxu0 %vm5019_vm2, %v5018_v1  ;;  %v901_v51 = vsel %vm5231_vm8, %v899_v44, %v900_v39  ;;  %v904_v52 = vsel %vm5231_vm8, %v902_v45, %v903_v42  ;;  %v908_v53 = vsel %vm5231_vm8, %v4138_v43, %v907_v46  ;;  %v909_v54 = vrot.slane %v907_v46, 2 }
  0x4e   : > { %4540 = vmatprep.mubr.msk.bf16.mxu1 %vm5019_vm2, %v5018_v1  ;;  %v912_v55 = vrot.slane %v910_v47, 2  ;;  %v915_v56 = vrot.slane %v913_v48, 2  ;;  %v918_v22 = vrot.slane %v916_v49, 2  ;;  %v973_v57 = vcombine.low %v898_v34, %v901_v51  ;;  %4590 = vmatprep.subr.bf16.mxu0 %v5018_v1 }
  0x4f   : > { %v911_v59 = vsel %vm5231_vm8, %v909_v54, %v910_v47  ;;  %v974_v61 = vcombine.low %v904_v52, %v908_v53  ;;  %v793_v62 = vcombine.low %v5245_v25, %v5313_v10  ;;  %v794_v63 = vcombine.low %v5256_v29, %v5318_v15 }
  0x50   : > { %v914_v0 = vsel %vm5231_vm8, %v912_v55, %v913_v48  ;;  %v917_v2 = vsel %vm5231_vm8, %v915_v56, %v916_v49  ;;  %v920_v3 = vsel %vm5231_vm8, %v918_v22, %v919_v50  ;;  %v981_v5 = vrot.slane %v973_v57, %v5199_v6 }
  0x51   : > { %v988_v7 = vrot.slane %v974_v61, %v5199_v6  ;;  %v990_v8 = vcombine.low %v911_v59, %v914_v0  ;;  %v991_v9 = vcombine.low %v917_v2, %v920_v3  ;;  %v801_v11 = vrot.slane %v793_v62, %v5199_v6 }
  0x52   : > { %v808_v12 = vrot.slane %v794_v63, %v5199_v6  ;;  %v810_v13 = vcombine.low %v724_v32, %v5321_v17  ;;  %v811_v14 = vcombine.low %v5333_v36, %v5325_v18  ;;  %v726_v16 = vcombine.high %v5298_v60, %v5298_v60 }
  0x53   : > { %v989_v20 = vcombine.low %v981_v5, %v988_v7  ;;  %v998_v26 = vrot.slane %v990_v8, %v5199_v6  ;;  %v1005_v30 = vrot.slane %v991_v9, %v5199_v6  ;;  %v743_v33 = vcombine.high %v652_v58, %v652_v58 }
  0x54   : > { %v809_v38 = vcombine.low %v801_v11, %v808_v12  ;;  %v818_v39 = vrot.slane %v810_v13, %v5199_v6  ;;  %v825_v40 = vrot.slane %v811_v14, %v5199_v6  ;;  %v5397_v41 = vrot.slane %v726_v16, %v5199_v6 }
  0x55   : > { %v1006_v32 = vcombine.low %v998_v26, %v1005_v30  ;;  %v5400_v42 = vrot.slane %v652_v58, %v5199_v6  ;;  %v5403_v60 = vrot.slane %v743_v33, %v5199_v6  ;;  %v921_v43 = vrot.slane %v919_v50, 2 }
  0x56   : > { %v826_v34 = vcombine.low %v818_v39, %v825_v40  ;;  %v5407_v44 = vcombine.high %v5397_v41, %v5397_v41  ;;  %v922_v45 = vrot.slane %v5397_v41, 7  ;;  %v827_v46 = vcombine.low %v5337_v37, %v5397_v41 }
  0x57   : > { %v1039_v47 = vpack.c.bf16 %v1006_v32, %v989_v20  ;;  %v5414_v48 = vcombine.high %v5400_v42, %v5400_v42  ;;  %v5418_v49 = vcombine.high %v5403_v60, %v5403_v60  ;;  %v928_v50 = vrot.slane %v5400_v42, 7 }
  0x58   : > { %v859_v51 = vpack.c.bf16 %v826_v34, %v809_v38  ;;  %v923_v52 = vsel %vm5231_vm8, %v921_v43, %v922_v45  ;;  %v924_v53 = vrot.slane %v922_v45, 2  ;;  %v925_v54 = vrot.slane %v5407_v44, 7 }
  0x59   : > { %4527 = vmatmul.mubr.msk.bf16.gmra.mxu0 %vm1043_vm9, %v1039_v47  ;;  %v930_v55 = vrot.slane %v928_v50, 2  ;;  %v931_v56 = vrot.slane %v5414_v48, 7  ;;  %v934_v22 = vrot.slane %v5403_v60, 7  ;;  %v937_v57 = vrot.slane %v5418_v49, 7 }
  0x5a   : > { %4541 = vmatmul.mubr.msk.bf16.gmra.mxu1 %vm1043_vm9, %v859_v51  ;;  %4530 = vmatprep.mubr.msk.bf16.mxu0 %vm5019_vm2, %v5018_v1  ;;  %v926_v58 = vsel %vm5231_vm8, %v924_v53, %v925_v54  ;;  %v927_v59 = vrot.slane %v925_v54, 2  ;;  %v828_v61 = vcombine.low %v5407_v44, %v5400_v42  ;;  %v835_v62 = vrot.slane %v827_v46, %v5199_v6 }
  0x5b   : > { %4544 = vmatprep.mubr.msk.bf16.mxu1 %vm5019_vm2, %v5018_v1  ;;  %v932_v63 = vsel %vm5231_vm8, %v930_v55, %v931_v56  ;;  %v933_v0 = vrot.slane %v931_v56, 2  ;;  %v936_v2 = vrot.slane %v934_v22, 2  ;;  %v1007_v3 = vcombine.low %v923_v52, %v926_v58  ;;  %v4826_v55 = vld [vmem:[%s5222_s20 + $0x70] sm:$0xff]   ;;  %v4827_v56 = vld [vmem:[%s5222_s20 + $0x28] sm:$0xff]   ;;  %v4830_v58 = vld [vmem:[%s5222_s20 + $0x60] sm:$0xff]  }
  0x5c   : > { %v929_v5 = vsel %vm5231_vm8, %v927_v59, %v928_v50  ;;  %v842_v7 = vrot.slane %v828_v61, %v5199_v6  ;;  %v844_v8 = vcombine.low %v5414_v48, %v5403_v60  ;;  %v1183_v9 = vcombine.low %v5242_v24, %v5240_v23  ;;  %v4831_v59 = vld [vmem:[%s5222_s20 + $0x18] sm:$0xff]  }
  0x5d   : > { %v935_v11 = vsel %vm5231_vm8, %v933_v0, %v934_v22  ;;  %v938_v12 = vsel %vm5231_vm8, %v936_v2, %v937_v57  ;;  %v1008_v13 = vcombine.low %v929_v5, %v932_v63  ;;  %v1015_v14 = vrot.slane %v1007_v3, %v5199_v6  ;;  %v4828_v22 = vld [vmem:[%s5222_s20 + $0x68] sm:$0xff]   ;;  %v4829_v57 = vld [vmem:[%s5222_s20 + $0x20] sm:$0xff]   ;;  %v4832_v61 = vld [vmem:[%s5222_s20 + $0x58] sm:$0xff]  }
  0x5e   : > { %v1024_v16 = vcombine.low %v935_v11, %v938_v12  ;;  %v843_v20 = vcombine.low %v835_v62, %v842_v7  ;;  %v851_v26 = vrot.slane %v844_v8, %v5199_v6  ;;  %v1184_v30 = vcombine.low %v5261_v31, %v5226_v19  ;;  %v4833_v62 = vld [vmem:[%s5222_s20 + $0x10] sm:$0xff]   ;;  %v4835_v0 = vld [vmem:[%s5222_s20 + $0x8] sm:$0xff]   ;;  %v4837_v3 = vld [vmem:[%s5222_s20] sm:$0xff]  }
  0x5f   : > { %v1022_v33 = vrot.slane %v1008_v13, %v5199_v6  ;;  %v1200_v23 = vcombine.low %v5253_v28, %v5249_v27  ;;  %v1201_v24 = vcombine.low %v5268_v35, %v5245_v25  ;;  %v1191_v40 = vrot.slane %v1183_v9, %v5199_v6  ;;  %v4834_v63 = vld [vmem:[%s5222_s20 + $0x50] sm:$0xff]   ;;  %v4836_v2 = vld [vmem:[%s5222_s20 + $0x48] sm:$0xff]   ;;  %v4838_v5 = vld [vmem:[%s5222_s20 + $0x40] sm:$0xff]  }
  0x60   : > { %v1031_v38 = vrot.slane %v1024_v16, %v5199_v6  ;;  %v860_v39 = vpack.c.bf16 %v851_v26, %v843_v20  ;;  %v1198_v43 = vrot.slane %v1184_v30, %v5199_v6  ;;  %v1217_v27 = vcombine.low %v5313_v10, %v5256_v29 }
  0x61   : > { %v1023_v32 = vcombine.low %v1015_v14, %v1022_v33  ;;  %v1208_v34 = vrot.slane %v1200_v23, %v5199_v6  ;;  %v1215_v19 = vrot.slane %v1201_v24, %v5199_v6  ;;  %v4146_v28 = vcombine.high %v5256_v29, %v5318_v15 }
  0x62   : > { %4545 = vmatmul.mubr.msk.bf16.gmra.mxu1 %vm1043_vm9, %v860_v39  ;;  %v1199_v31 = vcombine.low %v1191_v40, %v1198_v43  ;;  %v1234_v45 = vcombine.low %v5321_v17, %v5333_v36  ;;  %v1235_v46 = vcombine.low %v5325_v18, %v5337_v37  ;;  %v1225_v47 = vrot.slane %v1217_v27, %v5199_v6 }
  0x63   : > { %v1040_v25 = vpack.c.bf16 %v1031_v38, %v1023_v32  ;;  %4578 = vmatprep.mubr.msk.bf16.mxu1 %vm5019_vm2, %v5018_v1  ;;  %v1216_v35 = vcombine.low %v1208_v34, %v1215_v19  ;;  %v1232_v50 = vrot.slane %v4146_v28, %v5199_v6  ;;  %v1251_v18 = vcombine.low %v5397_v41, %v5407_v44 }
  0x64   : > { %v1242_v29 = vrot.slane %v1234_v45, %v5199_v6  ;;  %v1249_v15 = vrot.slane %v1235_v46, %v5199_v6  ;;  %v1252_v36 = vcombine.low %v5400_v42, %v5414_v48  ;;  %v1268_v54 = vcombine.low %v5403_v60, %v5418_v49  ;;  %v4823_v60 = vld [vmem:[%s5222_s20 + $0x38] sm:$0xff]   ;;  %v4825_v49 = vld [vmem:[%s5222_s20 + $0x30] sm:$0xff]   ;;  %v5554_v45 = vld [vmem:[%s605_s19] ss:$0 sm:$0xff]  ;;  %s633_s19 = scalar_lea.vmem %s6202_s10, %s4133_s24 }
  0x65   : > { %4531 = vmatmul.mubr.msk.bf16.gmra.mxu0 %vm1043_vm9, %v1040_v25  ;;  %v1282_v10 = vpack.c.bf16 %v1216_v35, %v1199_v31  ;;  %v1233_v51 = vcombine.low %v1225_v47, %v1232_v50  ;;  %v1259_v52 = vrot.slane %v1251_v18, %v5199_v6  ;;  %v4824_v48 = vld [vmem:[%s5222_s20 + $0x78] sm:$0xff]  }
  0x66   : > { %4550 = vmatprep.mubr.msk.bf16.mxu0 %vm5019_vm2, %v5018_v1  ;;  %v1250_v17 = vcombine.low %v1242_v29, %v1249_v15  ;;  %v1266_v53 = vrot.slane %v1252_v36, %v5199_v6  ;;  %v1275_v42 = vrot.slane %v1268_v54, %v5199_v6  ;;  %4563 = vmatpush3.bf16.msra.mxu1 %v4824_v48 }
  0x67   : > { %4564 = vmatprep.subr.bf16.mxu1 %v5018_v1 }
  0x68   : > { %v1283_v37 = vpack.c.bf16 %v1250_v17, %v1233_v51  ;;  %v1267_v41 = vcombine.low %v1259_v52, %v1266_v53 }
  0x6a   : > { %v1284_v44 = vpack.c.bf16 %v1275_v42, %v1267_v41  ;;  %4565 = vmatpush3.bf16.msra.mxu1 %v4826_v55 }
  0x6b   : > { %4566 = vmatprep.subr.bf16.mxu1 %v5018_v1 }
  0x6d   : > { %4551 = vmatmul.mubr.msk.bf16.vlgmr.msra.gmra.mxu0 %vm1043_vm9, %v1282_v10 }
  0x6e   : > { %4554 = vmatprep.mubr.msk.bf16.mxu0 %vm5019_vm2, %v5018_v1  ;;  %4591 = vmatpush3.bf16.msra.mxu0 %v4823_v60 }
  0x6f   : > { %4592 = vmatprep.subr.bf16.mxu0 %v5018_v1  ;;  %4567 = vmatpush3.bf16.msra.mxu1 %v4828_v22 }
  0x70   : > { %4568 = vmatprep.subr.bf16.mxu1 %v5018_v1 }
  0x72   : > { %4593 = vmatpush3.bf16.msra.mxu0 %v4825_v49 }
  0x73   : > { %4594 = vmatprep.subr.bf16.mxu0 %v5018_v1  ;;  %4569 = vmatpush3.bf16.msra.mxu1 %v4830_v58 }
  0x74   : > { %4570 = vmatprep.subr.bf16.mxu1 %v5018_v1 }
  0x75   : > { %4555 = vmatmul.mubr.msk.bf16.gmra.mxu0 %vm1043_vm9, %v1283_v37 }
  0x76   : > { %4558 = vmatprep.mubr.msk.bf16.mxu0 %vm5019_vm2, %v5018_v1  ;;  %4595 = vmatpush3.bf16.msra.mxu0 %v4827_v56 }
  0x77   : > { %4596 = vmatprep.subr.bf16.mxu0 %v5018_v1  ;;  %4571 = vmatpush3.bf16.msra.mxu1 %v4832_v61 }
  0x78   : > { %4572 = vmatprep.subr.bf16.mxu1 %v5018_v1 }
  0x7a   : > { %4597 = vmatpush3.bf16.msra.mxu0 %v4829_v57 }
  0x7b   : > { %4598 = vmatprep.subr.bf16.mxu0 %v5018_v1  ;;  %4573 = vmatpush3.bf16.msra.mxu1 %v4834_v63 }
  0x7c   : > { %4574 = vmatprep.subr.bf16.mxu1 %v5018_v1 }
  0x7d   : > { %4559 = vmatmul.mubr.msk.bf16.gmra.mxu0 %vm1043_vm9, %v1284_v44 }
  0x7e   : > { %4606 = vmatprep.mubr.msk.bf16.mxu0 %vm5019_vm2, %v5018_v1  ;;  %4599 = vmatpush3.bf16.msra.mxu0 %v4831_v59 }
  0x7f   : > { %4600 = vmatprep.subr.bf16.mxu0 %v5018_v1  ;;  %4575 = vmatpush3.bf16.msra.mxu1 %v4836_v2 }
  0x80   : > { %4576 = vmatprep.subr.bf16.mxu1 %v5018_v1 }
  0x82   : > { %4601 = vmatpush3.bf16.msra.mxu0 %v4833_v62 }
  0x83   : > { %4602 = vmatprep.subr.bf16.mxu0 %v5018_v1  ;;  %4577 = vmatpush3.bf16.msra.mxu1 %v4838_v5 }
  0x84   : > { %4618 = vmatprep.subr.bf16.mxu1 %v5018_v1 }
  0x86   : > { %4603 = vmatpush3.bf16.msra.mxu0 %v4835_v0 }
  0x87   : > { %4604 = vmatprep.subr.bf16.mxu0 %v5018_v1 }
  0x8a   : > { %4605 = vmatpush3.bf16.msra.mxu0 %v4837_v3 }
  0x8b   : > { %4646 = vmatprep.subr.bf16.mxu0 %v5018_v1 }
 0x10c   : > { %v1091_v7 = vpop.f32.mrf.mxu0  ;;  %v1160_v8 = vpop.f32.mrf.mxu1 }
 0x10d   : > { %v1161_v31 = vadd.f32 %v1160_v8, %v1091_v7 }
 0x10e   : > { %v4524_v9 = vpop.f32.mrf.mxu0  ;;  %v4538_v11 = vpop.f32.mrf.mxu1 }
 0x110   : > { %v1094_v12 = vpop.f32.mrf.mxu0  ;;  %v1163_v13 = vpop.f32.mrf.mxu1 }
 0x111   : > { %v1164_v10 = vadd.f32 %v1163_v13, %v1094_v12 }
 0x112   : > { %v4525_v14 = vpop.f32.mrf.mxu0  ;;  %v4539_v16 = vpop.f32.mrf.mxu1 }
 0x119   : > { %v1099_v20 = vpop.f32.mrf.mxu0 }
 0x11a   : > { %v1168_v26 = vpop.f32.mrf.mxu1 }
 0x11b   : > { %v4528_v30 = vpop.f32.mrf.mxu0  ;;  %v1169_v22 = vadd.f32 %v1168_v26, %v1099_v20 }
 0x11c   : > { %v4542_v33 = vpop.f32.mrf.mxu1 }
 0x11d   : > { %v1102_v23 = vpop.f32.mrf.mxu0 }
 0x11e   : > { %v1171_v24 = vpop.f32.mrf.mxu1 }
 0x11f   : > { %v4529_v38 = vpop.f32.mrf.mxu0  ;;  %v1172_v62 = vadd.f32 %v1171_v24, %v1102_v23 }
 0x120   : > { %v4543_v39 = vpop.f32.mrf.mxu1 }
 0x122   : > { %v1176_v40 = vpop.f32.mrf.mxu1 }
 0x124   : > { %v4546_v32 = vpop.f32.mrf.mxu1 }
 0x125   : > { %v1107_v43 = vpop.f32.mrf.mxu0 }
 0x126   : > { %v5546_v34 = vpop.f32.mrf.mxu1  ;;  %v1177_v3 = vadd.f32 %v1176_v40, %v1107_v43 }
 0x127   : > { %v4532_v19 = vpop.f32.mrf.mxu0 }
 0x128   : > { %v4547_v25 = vpop.f32.mrf.mxu1 }
 0x129   : > { %v5548_v27 = vpop.f32.mrf.mxu0 }
 0x12b   : > { %v4533_v28 = vpop.f32.mrf.mxu0 }
 0x12d   : > { %v1333_v35 = vpop.f32.mrf.mxu0 }
 0x12e   : > { %v1356_v46 = vadd.f32 %v1333_v35, %v1161_v31 }
 0x12f   : > { %v4552_v47 = vpop.f32.mrf.mxu0 }
 0x130   : > { %v1369_v50 = vadd.f32 %v5554_v45, %v1356_v46  ;;  %v1180_v47 = vadd.f32 %v5546_v34, %v5548_v27 }
 0x131   : > { %v1336_v29 = vpop.f32.mrf.mxu0 }
 0x132   : > { %v1381_v15 = vcombine.high %v1369_v50, %v1369_v50  ;;  %v1388_v51 = vrot.slane %v1369_v50, %v5199_v6  ;;  %v1357_v17 = vadd.f32 %v1336_v29, %v1164_v10 }
 0x133   : > { %v4553_v18 = vpop.f32.mrf.mxu0 }
 0x134   : > { %v1395_v36 = vrot.slane %v1381_v15, %v5199_v6  ;;  %v1396_v37 = vcombine.high %v1388_v51, %v1388_v51  ;;  %v1370_v52 = vadd.f32 %v5554_v45, %v1357_v17  ;;  %v1496_v49 = vmax.f32 %v1388_v51, 0.0 }
 0x135   : > { %v1341_v53 = vpop.f32.mrf.mxu0 }
 0x136   : > { %v1397_v54 = vcombine.high %v1395_v36, %v1395_v36  ;;  %v5560_v41 = vmax.f32 %v1396_v37, 0.0  ;;  %v5562_v42 = vmax.f32 %v1395_v36, 0.0  ;;  %v1398_v44 = vcombine.high %v1370_v52, %v1370_v52 }
 0x137   : > { %v1405_v60 = vrot.slane %v1370_v52, %v5199_v6  ;;  %v4556_v48 = vpop.f32.mrf.mxu0  ;;  %v4152_v11 = vrot.slane %v1496_v49, 9  ;;  %v1358_v14 = vadd.f32 %v1341_v53, %v1169_v22 }
 0x138   : > { %v5565_v55 = vmax.f32 %v1397_v54, 0.0  ;;  %v1651_v56 = vrot.slane %v5560_v41, 7  ;;  %v1654_v57 = vrot.slane %v5562_v42, 7  ;;  %v1412_v58 = vrot.slane %v1398_v44, %v5199_v6 }
 0x139   : > { %v1413_v59 = vcombine.high %v1405_v60, %v1405_v60  ;;  %v1344_v61 = vpop.f32.mrf.mxu0  ;;  %v5572_v2 = vmax.f32 %v1405_v60, 0.0  ;;  %v1538_v5 = vcombine.low %v1496_v49, %v5560_v41  ;;  %v1371_v53 = vadd.f32 %v5554_v45, %v1358_v14 }
 0x13a   : > { %v1539_v63 = vcombine.low %v5562_v42, %v5565_v55  ;;  %v1653_v0 = vrot.slane %v1651_v56, 2  ;;  %v1657_v7 = vrot.slane %v5565_v55, 7  ;;  %v1414_v8 = vcombine.high %v1412_v58, %v1412_v58 }
 0x13b   : > { %v4557_v9 = vpop.f32.mrf.mxu0  ;;  %v5576_v12 = vmax.f32 %v1413_v59, 0.0  ;;  %v5578_v13 = vmax.f32 %v1412_v58, 0.0  ;;  %v1656_v20 = vrot.slane %v1654_v57, 2  ;;  %v1660_v38 = vrot.slane %v5572_v2, 7 }
 0x13c   : > { %v1553_v16 = vrot.slane %v1539_v63, %v5199_v6  ;;  %v1659_v26 = vrot.slane %v1657_v7, 2  ;;  %v5581_v30 = vmax.f32 %v1414_v8, 0.0  ;;  %v1655_v23 = vsel %vm5231_vm8, %v1653_v0, %v1654_v57 }
 0x13d   : > { %v1349_v33 = vpop.f32.mrf.mxu0  ;;  %v1555_v24 = vcombine.low %v5572_v2, %v5576_v12  ;;  %v1663_v39 = vrot.slane %v5576_v12, 7  ;;  %v1546_v40 = vrot.slane %v1538_v5, %v5199_v6  ;;  %v1666_v43 = vrot.slane %v5578_v13, 7 }
 0x13e   : > { %v1556_v32 = vcombine.low %v5578_v13, %v5581_v30  ;;  %v1669_v19 = vrot.slane %v5581_v30, 7  ;;  %v1652_v28 = vsel %vm5231_vm8, %v4152_v11, %v1651_v56  ;;  %v1661_v31 = vsel %vm5231_vm8, %v1659_v26, %v1660_v38 }
 0x13f   : > { %v4560_v25 = vpop.f32.mrf.mxu0  ;;  %v1662_v35 = vrot.slane %v1660_v38, 2  ;;  %v1665_v46 = vrot.slane %v1663_v39, 2  ;;  %v1711_v10 = vcombine.low %v1652_v28, %v1655_v23  ;;  %v1658_v29 = vsel %vm5231_vm8, %v1656_v20, %v1657_v7 }
 0x140   : > { %v1570_v50 = vrot.slane %v1556_v32, %v5199_v6  ;;  %v1554_v51 = vcombine.low %v1546_v40, %v1553_v16  ;;  %v1563_v17 = vrot.slane %v1555_v24, %v5199_v6  ;;  %v1668_v36 = vrot.slane %v1666_v43, 2 }
 0x141   : > { %v1352_v15 = vpop.f32.mrf.mxu0  ;;  %v5606_v18 = vsel %vm5231_vm8, %v1665_v46, %v1666_v43  ;;  %v1671_v37 = vrot.slane %v1669_v19, 2  ;;  %v1712_v52 = vcombine.low %v1658_v29, %v1661_v31  ;;  %v1359_v34 = vadd.f32 %v1344_v61, %v1172_v62 }
 0x142   : > { %v5611_v54 = vsel %vm5231_vm8, %v1662_v35, %v1663_v39  ;;  %v1360_v44 = vadd.f32 %v1349_v33, %v1177_v3  ;;  %v1361_v60 = vadd.f32 %v1352_v15, %v1180_v47  ;;  %v1571_v48 = vcombine.low %v1563_v17, %v1570_v50 }
 0x143   : > { %v4561_v27 = vpop.f32.mrf.mxu0  ;;  %v1728_v49 = vcombine.low %v5611_v54, %v5606_v18  ;;  %v1415_v56 = vcombine.high %v1371_v53, %v1371_v53  ;;  %v1422_v22 = vrot.slane %v1371_v53, %v5199_v6  ;;  %v1372_v57 = vadd.f32 %v5554_v45, %v1359_v34 }
 0x144   : > { %v5619_v58 = vsel %vm5231_vm8, %v1668_v36, %v1669_v19  ;;  %v1373_v59 = vadd.f32 %v5554_v45, %v1360_v44  ;;  %v1374_v61 = vadd.f32 %v5554_v45, %v1361_v60  ;;  %v1628_v62 = vpack.c.bf16 %v1571_v48, %v1554_v51 }
 0x145   : > { %v5624_v63 = vrot.slane %v1415_v56, %v5199_v6  ;;  %v1430_v0 = vcombine.high %v1422_v22, %v1422_v22  ;;  %v5626_v3 = vmax.f32 %v1422_v22, 0.0  ;;  %v1432_v5 = vcombine.high %v1372_v57, %v1372_v57 }
 0x146   : > { %v1439_v7 = vrot.slane %v1372_v57, %v5199_v6  ;;  %v1449_v8 = vcombine.high %v1373_v59, %v1373_v59  ;;  %4607 = vmatmul.mubr.bf16.vlgmr.msra.gmra.mxu0 %v1628_v62  ;;  %v5630_v9 = vrot.slane %v1711_v10, %v5199_v6  ;;  %v5633_v11 = vrot.slane %v1712_v52, %v5199_v6 }
 0x147   : > { %v1431_v45 = vcombine.high %v5624_v63, %v5624_v63  ;;  %v5637_v14 = vmax.f32 %v1430_v0, 0.0  ;;  %v1506_v16 = vmax.f32 %v5624_v63, 0.0  ;;  %v1672_v20 = vrot.slane %v5626_v3, 7  ;;  %4610 = vmatprep.mubr.msk.bf16.mxu0 %vm5019_vm2, %v5018_v1 }
 0x148   : > { %v1446_v26 = vrot.slane %v1432_v5, %v5199_v6  ;;  %v1447_v33 = vcombine.high %v1439_v7, %v1439_v7  ;;  %v5644_v23 = vmax.f32 %v1439_v7, 0.0  ;;  %v1456_v24 = vrot.slane %v1373_v59, %v5199_v6 }
 0x149   : > { %v1507_v38 = vmax.f32 %v1431_v45, 0.0  ;;  %v1673_v39 = vsel %vm5231_vm8, %v1671_v37, %v1672_v20  ;;  %v1675_v40 = vrot.slane %v5637_v14, 7  ;;  %v1472_v32 = vrot.slane %v1374_v61, %v5199_v6 }
 0x14a   : > { %v1674_v43 = vrot.slane %v1672_v20, 2  ;;  %v1678_v19 = vrot.slane %v1506_v16, 7  ;;  %v1729_v25 = vcombine.low %v5619_v58, %v1673_v39  ;;  %v1448_v28 = vcombine.high %v1446_v26, %v1446_v26 }
 0x14b   : > { %v1677_v31 = vrot.slane %v1675_v40, 2  ;;  %v4153_v35 = vrot.slane %v1507_v38, 9  ;;  %v5654_v46 = vmax.f32 %v1447_v33, 0.0  ;;  %v5656_v47 = vmax.f32 %v1446_v26, 0.0 }
 0x14c   : > { %v5658_v10 = vmax.f32 %v1448_v28, 0.0  ;;  %v1682_v50 = vrot.slane %v5644_v23, 7  ;;  %v1463_v29 = vrot.slane %v1449_v8, %v5199_v6  ;;  %v1464_v15 = vcombine.high %v1456_v24, %v1456_v24  ;;  %v4839_v28 = vld [vmem:[%s5222_s20 + $0xb8] sm:$0xff]  }
 0x14d   : > { %v1685_v51 = vrot.slane %v5654_v46, 7  ;;  %v1688_v17 = vrot.slane %v5656_v47, 7  ;;  %v5664_v18 = vmax.f32 %v1456_v24, 0.0  ;;  %v1473_v36 = vcombine.high %v1472_v32, %v1472_v32 }
 0x14e   : > { %v1684_v37 = vrot.slane %v1682_v50, 2  ;;  %v1691_v52 = vrot.slane %v5658_v10, 7  ;;  %v1465_v53 = vcombine.high %v1463_v29, %v1463_v29  ;;  %v5667_v34 = vmax.f32 %v1464_v15, 0.0 }
 0x14f   : > { %v1687_v27 = vrot.slane %v1685_v51, 2  ;;  %v1690_v54 = vrot.slane %v1688_v17, 2  ;;  %v5669_v44 = vmax.f32 %v1463_v29, 0.0  ;;  %v1694_v60 = vrot.slane %v5664_v18, 7 }
 0x150   : > { %v5672_v48 = vmax.f32 %v1465_v53, 0.0  ;;  %v1697_v56 = vrot.slane %v5667_v34, 7  ;;  %v5675_v22 = vmax.f32 %v1472_v32, 0.0  ;;  %v5677_v57 = vmax.f32 %v1473_v36, 0.0 }
 0x151   : > { %v1696_v58 = vrot.slane %v1694_v60, 2  ;;  %v1700_v59 = vrot.slane %v5669_v44, 7  ;;  %v1727_v61 = vcombine.low %v5630_v9, %v5633_v11  ;;  %v1736_v62 = vrot.slane %v1728_v49, %v5199_v6 }
 0x152   : > { %v1699_v0 = vrot.slane %v1697_v56, 2  ;;  %v1703_v5 = vrot.slane %v5672_v48, 7  ;;  %v1706_v7 = vrot.slane %v5675_v22, 7  ;;  %v1709_v8 = vrot.slane %v5677_v57, 7 }
 0x153   : > { %v1743_v45 = vrot.slane %v1729_v25, %v5199_v6  ;;  %v1572_v20 = vcombine.low %v5626_v3, %v5637_v14  ;;  %v1573_v26 = vcombine.low %v1507_v38, %v5644_v23  ;;  %v1589_v9 = vcombine.low %v5654_v46, %v5656_v47 }
 0x154   : > { %v1708_v11 = vrot.slane %v1706_v7, 2  ;;  %v1590_v49 = vcombine.low %v5658_v10, %v5664_v18  ;;  %v1676_v33 = vsel %vm5231_vm8, %v1674_v43, %v1675_v40  ;;  %v1679_v24 = vsel %vm5231_vm8, %v1677_v31, %v1678_v19 }
 0x155   : > { %v1744_v39 = vcombine.low %v1736_v62, %v1743_v45  ;;  %v1580_v32 = vrot.slane %v1572_v20, %v5199_v6  ;;  %v1587_v25 = vrot.slane %v1573_v26, %v5199_v6  ;;  %v1597_v38 = vrot.slane %v1589_v9, %v5199_v6 }
 0x156   : > { %v1604_v29 = vrot.slane %v1590_v49, %v5199_v6  ;;  %v1683_v15 = vsel %vm5231_vm8, %v4153_v35, %v1682_v50  ;;  %v1686_v36 = vsel %vm5231_vm8, %v1684_v37, %v1685_v51  ;;  %v1689_v40 = vsel %vm5231_vm8, %v1687_v27, %v1688_v17 }
 0x157   : > { %v1801_v43 = vpack.c.bf16 %v1744_v39, %v1727_v61  ;;  %v1588_v19 = vcombine.low %v1580_v32, %v1587_v25  ;;  %v1692_v31 = vsel %vm5231_vm8, %v1690_v54, %v1691_v52  ;;  %v1693_v53 = vrot.slane %v1691_v52, 2  ;;  %v4840_v52 = vld [vmem:[%s5222_s20 + $0xb0] sm:$0xff]   ;;  %v4841_v25 = vld [vmem:[%s5222_s20 + $0xa8] sm:$0xff]  }
 0x158   : > { %v1605_v62 = vcombine.low %v1597_v38, %v1604_v29  ;;  %v1698_v45 = vsel %vm5231_vm8, %v1696_v58, %v1697_v56  ;;  %v1745_v20 = vcombine.low %v1676_v33, %v1679_v24  ;;  %v1746_v26 = vcombine.low %v1683_v15, %v1686_v36 }
 0x159   : > { %4579 = vmatmul.mubr.bf16.vlgmr.msra.gmra.mxu1 %v1801_v43  ;;  %v1695_v35 = vsel %vm5231_vm8, %v1693_v53, %v1694_v60  ;;  %v1762_v50 = vcombine.low %v1689_v40, %v1692_v31  ;;  %v1606_v51 = vcombine.low %v5667_v34, %v5669_v44  ;;  %v1607_v17 = vcombine.low %v5672_v48, %v5675_v22  ;;  %v4843_v43 = vld [vmem:[%s5222_s20 + $0x98] sm:$0xff]   ;;  %v4844_v31 = vld [vmem:[%s5222_s20 + $0x90] sm:$0xff]  }
 0x15a   : > { %4619 = vmatpush3.bf16.msra.mxu1 %v4839_v28  ;;  %v1629_v37 = vpack.c.bf16 %v1605_v62, %v1588_v19  ;;  %4582 = vmatprep.mubr.msk.bf16.mxu1 %vm5019_vm2, %v5018_v1  ;;  %v1702_v27 = vrot.slane %v1700_v59, 2  ;;  %v1760_v54 = vrot.slane %v1746_v26, %v5199_v6  ;;  %v1763_v60 = vcombine.low %v1695_v35, %v1698_v45 }
 0x15b   : > { %4620 = vmatprep.subr.bf16.mxu1 %v5018_v1  ;;  %v1621_v56 = vrot.slane %v1607_v17, %v5199_v6  ;;  %v1614_v58 = vrot.slane %v1606_v51, %v5199_v6  ;;  %v1701_v61 = vsel %vm5231_vm8, %v1699_v0, %v1700_v59  ;;  %v1705_v49 = vrot.slane %v1703_v5, 2 }
 0x15c   : > { %4611 = vmatmul.mubr.bf16.gmra.mxu0 %v1629_v37  ;;  %v1704_v9 = vsel %vm5231_vm8, %v1702_v27, %v1703_v5  ;;  %v1753_v33 = vrot.slane %v1745_v20, %v5199_v6  ;;  %v1770_v24 = vrot.slane %v1762_v50, %v5199_v6  ;;  %v1777_v39 = vrot.slane %v1763_v60, %v5199_v6  ;;  %v4845_v20 = vld [vmem:[%s5222_s20 + $0x88] sm:$0xff]   ;;  %v4846_v50 = vld [vmem:[%s5222_s20 + $0x80] sm:$0xff]  }
 0x15d   : > { %4614 = vmatprep.mubr.msk.bf16.mxu0 %vm5019_vm2, %v5018_v1  ;;  %v1710_v32 = vsel %vm5231_vm8, %v1708_v11, %v1709_v8  ;;  %v1622_v59 = vcombine.low %v1614_v58, %v1621_v56  ;;  %v1707_v0 = vsel %vm5231_vm8, %v1705_v49, %v1706_v7  ;;  %v1779_v28 = vcombine.low %v1701_v61, %v1704_v9  ;;  %v4842_v8 = vld [vmem:[%s5222_s20 + $0xa0] sm:$0xff]   ;;  %v4851_v60 = vld [vmem:[%s5375_s30 + $0x68] sm:$0xff]   ;;  %v4855_v9 = vld [vmem:[%s5375_s30 + $0x58] sm:$0xff]  }
 0x15e   : > { %4621 = vmatpush3.bf16.msra.mxu1 %v4840_v52  ;;  %v1761_v5 = vcombine.low %v1753_v33, %v1760_v54  ;;  %v1778_v38 = vcombine.low %v1770_v24, %v1777_v39  ;;  %v1780_v29 = vcombine.low %v1707_v0, %v1710_v32  ;;  %v2047_v53 = vcombine.low %v5581_v30, %v5626_v3  ;;  %v4852_v56 = vld [vmem:[%s5375_s30 + $0x28] sm:$0xff]   ;;  %v4853_v58 = vld [vmem:[%s5375_s30 + $0x60] sm:$0xff]   ;;  %v4856_v49 = vld [vmem:[%s5375_s30 + $0x18] sm:$0xff]  }
 0x15f   : > { %4622 = vmatprep.subr.bf16.mxu1 %v5018_v1  ;;  %v1630_v40 = vpack.c.bf16 %v1622_v59, %v1622_v59  ;;  %v1787_v11 = vrot.slane %v1779_v28, %v5199_v6  ;;  %v2030_v62 = vcombine.low %v5565_v55, %v5572_v2  ;;  %v2046_v45 = vcombine.low %v5576_v12, %v5578_v13  ;;  %v4854_v61 = vld [vmem:[%s5375_s30 + $0x20] sm:$0xff]   ;;  %v4857_v33 = vld [vmem:[%s5375_s30 + $0x50] sm:$0xff]   ;;  %v4859_v39 = vld [vmem:[%s5375_s30 + $0x48] sm:$0xff]  }
 0x160   : > { %v1802_v15 = vpack.c.bf16 %v1778_v38, %v1761_v5  ;;  %v1794_v36 = vrot.slane %v1780_v29, %v5199_v6  ;;  %v2029_v26 = vcombine.low %v5560_v41, %v5562_v42  ;;  %v2061_v35 = vrot.slane %v2047_v53, %v5199_v6  ;;  %v4858_v24 = vld [vmem:[%s5375_s30 + $0x10] sm:$0xff]   ;;  %v4860_v32 = vld [vmem:[%s5375_s30 + $0x8] sm:$0xff]   ;;  %v4862_v59 = vld [vmem:[%s5375_s30] sm:$0xff]  }
 0x161   : > { %v2044_v30 = vrot.slane %v2030_v62, %v5199_v6  ;;  %v2054_v3 = vrot.slane %v2046_v45, %v5199_v6  ;;  %v2081_v12 = vcombine.low %v5664_v18, %v5667_v34  ;;  %v2064_v41 = vcombine.low %v5644_v23, %v5654_v46 }
 0x162   : > { %4623 = vmatpush3.bf16.msra.mxu1 %v4841_v25  ;;  %v1795_v7 = vcombine.low %v1787_v11, %v1794_v36  ;;  %v2037_v55 = vrot.slane %v2029_v26, %v5199_v6  ;;  %v2080_v42 = vcombine.low %v5656_v47, %v5658_v10  ;;  %v2063_v17 = vcombine.low %v5637_v14, %v1506_v16  ;;  %v4861_v25 = vld [vmem:[%s5375_s30 + $0x40] sm:$0xff]  }
 0x163   : > { %4583 = vmatmul.mubr.bf16.gmra.mxu1 %v1802_v15  ;;  %4624 = vmatprep.subr.bf16.mxu1 %v5018_v1  ;;  %v2062_v2 = vcombine.low %v2054_v3, %v2061_v35  ;;  %v2095_v37 = vrot.slane %v2081_v12, %v5199_v6  ;;  %v2078_v18 = vrot.slane %v2064_v41, %v5199_v6 }
 0x164   : > { %4615 = vmatmul.mubr.bf16.gmra.mxu0 %v1630_v40  ;;  %4586 = vmatprep.mubr.msk.bf16.mxu1 %vm5019_vm2, %v5018_v1  ;;  %v1803_v19 = vpack.c.bf16 %v1795_v7, %v1795_v7  ;;  %v2045_v13 = vcombine.low %v2037_v55, %v2044_v30  ;;  %v2088_v34 = vrot.slane %v2080_v42, %v5199_v6 }
 0x165   : > { %4662 = vmatprep.mubr.msk.bf16.mxu0 %vm5019_vm2, %v5018_v1  ;;  %v2071_v23 = vrot.slane %v2063_v17, %v5199_v6  ;;  %v2098_v63 = vcombine.low %v5675_v22, %v5677_v57  ;;  %v2097_v16 = vcombine.low %v5669_v44, %v5672_v48  ;;  %v4847_v44 = vld [vmem:[%s5375_s30 + $0x78] sm:$0xff]   ;;  %v4849_v22 = vld [vmem:[%s5375_s30 + $0x70] sm:$0xff]  }
 0x166   : > { %4625 = vmatpush3.bf16.msra.mxu1 %v4842_v8  ;;  %v2119_v51 = vpack.c.bf16 %v2062_v2, %v2045_v13  ;;  %v2096_v46 = vcombine.low %v2088_v34, %v2095_v37  ;;  %v4848_v48 = vld [vmem:[%s5375_s30 + $0x38] sm:$0xff]   ;;  %4647 = vmatpush3.bf16.msra.mxu0 %v4847_v44  ;;  %v4850_v57 = vld [vmem:[%s5375_s30 + $0x30] sm:$0xff]   ;;  %v5841_v13 = vld [vmem:[%s613_s22] ss:$0 sm:$0xff] }
 0x167   : > { %4626 = vmatprep.subr.bf16.mxu1 %v5018_v1  ;;  %v2079_v14 = vcombine.low %v2071_v23, %v2078_v18  ;;  %v2112_v10 = vrot.slane %v2098_v63, %v5199_v6  ;;  %v2105_v52 = vrot.slane %v2097_v16, %v5199_v6  ;;  %4648 = vmatprep.subr.bf16.mxu0 %v5018_v1 }
 0x169   : > { %v2120_v47 = vpack.c.bf16 %v2096_v46, %v2079_v14  ;;  %v2113_v27 = vcombine.low %v2105_v52, %v2112_v10 }
 0x16a   : > { %4627 = vmatpush3.bf16.msra.mxu1 %v4843_v43  ;;  %4649 = vmatpush3.bf16.msra.mxu0 %v4849_v22 }
 0x16b   : > { %4587 = vmatmul.mubr.bf16.gmra.mxu1 %v1803_v19  ;;  %4628 = vmatprep.subr.bf16.mxu1 %v5018_v1  ;;  %v2121_v54 = vpack.c.bf16 %v2113_v27, %v2113_v27 }
 0x16c   : > { %4634 = vmatprep.mubr.msk.bf16.mxu1 %vm5019_vm2, %v5018_v1  ;;  %4650 = vmatprep.subr.bf16.mxu0 %v5018_v1 }
 0x16e   : > { %4629 = vmatpush3.bf16.msra.mxu1 %v4844_v31  ;;  %4651 = vmatpush3.bf16.msra.mxu0 %v4851_v60 }
 0x16f   : > { %4630 = vmatprep.subr.bf16.mxu1 %v5018_v1  ;;  %4652 = vmatprep.subr.bf16.mxu0 %v5018_v1 }
 0x172   : > { %4631 = vmatpush3.bf16.msra.mxu1 %v4845_v20  ;;  %4653 = vmatpush3.bf16.msra.mxu0 %v4853_v58 }
 0x173   : > { %4632 = vmatprep.subr.bf16.mxu1 %v5018_v1  ;;  %4654 = vmatprep.subr.bf16.mxu0 %v5018_v1 }
 0x176   : > { %4633 = vmatpush3.bf16.msra.mxu1 %v4846_v50  ;;  %4655 = vmatpush3.bf16.msra.mxu0 %v4855_v9 }
 0x177   : > { %4666 = vmatprep.subr.bf16.mxu1 %v5018_v1  ;;  %4656 = vmatprep.subr.bf16.mxu0 %v5018_v1 }
 0x179   : > { %4635 = vmatmul.mubr.bf16.vlgmr.msra.gmra.mxu1 %v2119_v51 }
 0x17a   : > { %4638 = vmatprep.mubr.msk.bf16.mxu1 %vm5019_vm2, %v5018_v1  ;;  %4667 = vmatpush3.bf16.msra.mxu1 %v4848_v48 }
 0x17b   : > { %4668 = vmatprep.subr.bf16.mxu1 %v5018_v1  ;;  %4657 = vmatpush3.bf16.msra.mxu0 %v4857_v33 }
 0x17c   : > { %4658 = vmatprep.subr.bf16.mxu0 %v5018_v1 }
 0x17e   : > { %4669 = vmatpush3.bf16.msra.mxu1 %v4850_v57 }
 0x17f   : > { %4670 = vmatprep.subr.bf16.mxu1 %v5018_v1  ;;  %4659 = vmatpush3.bf16.msra.mxu0 %v4859_v39 }
 0x180   : > { %4660 = vmatprep.subr.bf16.mxu0 %v5018_v1 }
 0x181   : > { %4639 = vmatmul.mubr.bf16.gmra.mxu1 %v2120_v47 }
 0x182   : > { %4642 = vmatprep.mubr.msk.bf16.mxu1 %vm5019_vm2, %v5018_v1  ;;  %4671 = vmatpush3.bf16.msra.mxu1 %v4852_v56 }
 0x183   : > { %4672 = vmatprep.subr.bf16.mxu1 %v5018_v1  ;;  %4661 = vmatpush3.bf16.msra.mxu0 %v4861_v25 }
 0x184   : > { %4686 = vmatprep.subr.bf16.mxu0 %v5018_v1 }
 0x186   : > { %4673 = vmatpush3.bf16.msra.mxu1 %v4854_v61 }
 0x187   : > { %4674 = vmatprep.subr.bf16.mxu1 %v5018_v1 }
 0x189   : > { %4643 = vmatmul.mubr.bf16.gmra.mxu1 %v2121_v54 }
 0x18a   : > { %4682 = vmatprep.mubr.msk.bf16.mxu1 %vm5019_vm2, %v5018_v1  ;;  %4675 = vmatpush3.bf16.msra.mxu1 %v4856_v49 }
 0x18b   : > { %4676 = vmatprep.subr.bf16.mxu1 %v5018_v1 }
 0x18e   : > { %4677 = vmatpush3.bf16.msra.mxu1 %v4858_v24 }
 0x18f   : > { %4678 = vmatprep.subr.bf16.mxu1 %v5018_v1 }
 0x192   : > { %4679 = vmatpush3.bf16.msra.mxu1 %v4860_v32 }
 0x193   : > { %4680 = vmatprep.subr.bf16.mxu1 %v5018_v1 }
 0x196   : > { %4681 = vmatpush3.bf16.msra.mxu1 %v4862_v59 }
 0x197   : > { %4706 = vmatprep.subr.bf16.mxu1 %v5018_v1 }
 0x206   : > { %v2007_v0 = vpop.f32.mrf.mxu0 }
 0x208   : > { %v4608_v5 = vpop.f32.mrf.mxu0 }
 0x20a   : > { %v2010_v38 = vpop.f32.mrf.mxu0 }
 0x20c   : > { %v4609_v28 = vpop.f32.mrf.mxu0 }
 0x219   : > { %v1903_v29 = vpop.f32.mrf.mxu1 }
 0x21a   : > { %v2008_v2 = vadd.f32 %v2007_v0, %v1903_v29 }
 0x21b   : > { %v4580_v15 = vpop.f32.mrf.mxu1 }
 0x21c   : > { %v2015_v36 = vpop.f32.mrf.mxu0 }
 0x21d   : > { %v1906_v40 = vpop.f32.mrf.mxu1 }
 0x21e   : > { %v4612_v8 = vpop.f32.mrf.mxu0  ;;  %v2011_v51 = vadd.f32 %v2010_v38, %v1906_v40 }
 0x21f   : > { %v4581_v11 = vpop.f32.mrf.mxu1 }
 0x220   : > { %v5829_v7 = vpop.f32.mrf.mxu0 }
 0x222   : > { %v4613_v43 = vpop.f32.mrf.mxu0 }
 0x223   : > { %v1911_v19 = vpop.f32.mrf.mxu1 }
 0x224   : > { %v5831_v31 = vpop.f32.mrf.mxu0  ;;  %v2016_v44 = vadd.f32 %v2015_v36, %v1911_v19 }
 0x225   : > { %v4584_v53 = vpop.f32.mrf.mxu1 }
 0x226   : > { %v4616_v62 = vpop.f32.mrf.mxu0 }
 0x227   : > { %v5833_v45 = vpop.f32.mrf.mxu1 }
 0x228   : > { %v2026_v20 = vpop.f32.mrf.mxu0 }
 0x229   : > { %v4585_v26 = vpop.f32.mrf.mxu1 }
 0x22a   : > { %v4617_v35 = vpop.f32.mrf.mxu0 }
 0x22b   : > { %v5835_v30 = vpop.f32.mrf.mxu1 }
 0x22d   : > { %v4588_v3 = vpop.f32.mrf.mxu1 }
 0x22f   : > { %v1922_v50 = vpop.f32.mrf.mxu1 }
 0x231   : > { %v4589_v55 = vpop.f32.mrf.mxu1 }
 0x239   : > { %v2221_v12 = vpop.f32.mrf.mxu1 }
 0x23a   : > { %v2243_v41 = vadd.f32 %v2221_v12, %v2008_v2 }
 0x23b   : > { %v4636_v42 = vpop.f32.mrf.mxu1 }
 0x23c   : > { %v2255_v17 = vadd.f32 %v5841_v13, %v2243_v41 }
 0x23d   : > { %v2224_v37 = vpop.f32.mrf.mxu1 }
 0x23e   : > { %v2265_v18 = vcombine.high %v2255_v17, %v2255_v17  ;;  %v2275_v34 = vmax.f32 %v2255_v17, 0.0  ;;  %v2244_v23 = vadd.f32 %v2224_v37, %v2011_v51 }
 0x23f   : > { %v4637_v46 = vpop.f32.mrf.mxu1 }
 0x240   : > { %v2276_v63 = vmax.f32 %v2265_v18, 0.0  ;;  %v2301_v14 = vrot.slane %v2275_v34, %v5199_v6  ;;  %v2256_v16 = vadd.f32 %v5841_v13, %v2244_v23 }
 0x241   : > { %v2229_v47 = vpop.f32.mrf.mxu1 }
 0x242   : > { %v2302_v10 = vcombine.high %v2301_v14, %v2301_v14  ;;  %v2309_v52 = vrot.slane %v2276_v63, %v5199_v6  ;;  %v4211_v27 = vrot.slane %v2301_v14, 9  ;;  %v2266_v54 = vcombine.high %v2256_v16, %v2256_v16 }
 0x243   : > { %v2277_v48 = vmax.f32 %v2256_v16, 0.0  ;;  %v4640_v22 = vpop.f32.mrf.mxu1  ;;  %v2245_v32 = vadd.f32 %v2229_v47, %v2016_v44 }
 0x244   : > { %v2310_v57 = vcombine.high %v2309_v52, %v2309_v52  ;;  %v4212_v60 = vrot.slane %v2302_v10, 9  ;;  %v4213_v56 = vrot.slane %v2309_v52, 9  ;;  %v2455_v58 = vmax.f32 %v2301_v14, %v4211_v27 }
 0x245   : > { %v2278_v61 = vmax.f32 %v2266_v54, 0.0  ;;  %v2317_v9 = vrot.slane %v2277_v48, %v5199_v6  ;;  %v5848_v49 = vpop.f32.mrf.mxu1  ;;  %v2257_v62 = vadd.f32 %v5841_v13, %v2245_v32  ;;  %v2019_v14 = vadd.f32 %v5829_v7, %v5833_v45 }
 0x246   : > { %v4214_v33 = vrot.slane %v2310_v57, 9  ;;  %v2456_v24 = vmax.f32 %v2302_v10, %v4212_v60  ;;  %v2457_v39 = vmax.f32 %v2309_v52, %v4213_v56  ;;  %v2475_v25 = vpack.c.bf16 %v2455_v58, %v2455_v58 }
 0x247   : > { %v2318_v59 = vcombine.high %v2317_v9, %v2317_v9  ;;  %v2325_v0 = vrot.slane %v2278_v61, %v5199_v6  ;;  %v4215_v5 = vrot.slane %v2317_v9, 9  ;;  %v4641_v38 = vpop.f32.mrf.mxu1  ;;  %v2267_v48 = vcombine.high %v2257_v62, %v2257_v62 }
 0x248   : > { %v2458_v28 = vmax.f32 %v2310_v57, %v4214_v33  ;;  %v2476_v29 = vpack.c.bf16 %v2456_v24, %v2456_v24  ;;  %v2477_v15 = vpack.c.bf16 %v2457_v39, %v2457_v39  ;;  %v2683_v20 = vunpack.c.l.b16 %v2475_v25 }
 0x249   : > { %v4216_v36 = vrot.slane %v2318_v59, 9  ;;  %v4217_v40 = vrot.slane %v2325_v0, 9  ;;  %v2459_v8 = vmax.f32 %v2317_v9, %v4215_v5  ;;  %v2237_v11 = vpop.f32.mrf.mxu1  ;;  %v2326_v42 = vcombine.high %v2325_v0, %v2325_v0 }
 0x24a   : > { %v2478_v43 = vpack.c.bf16 %v2458_v28, %v2458_v28  ;;  %v2542_v19 = vunpack.c.l.b16 %v2476_v29  ;;  %v2543_v53 = vunpack.c.l.b16 %v2477_v15  ;;  %v2024_v22 = vadd.f32 %v5831_v31, %v5835_v30 }
 0x24b   : > { %v2460_v26 = vmax.f32 %v2318_v59, %v4216_v36  ;;  %v2461_v35 = vmax.f32 %v2325_v0, %v4217_v40  ;;  %v2479_v3 = vpack.c.bf16 %v2459_v8, %v2459_v8  ;;  %v4644_v50 = vpop.f32.mrf.mxu1  ;;  %v2279_v56 = vmax.f32 %v2257_v62, 0.0 }
 0x24c   : > { %v2544_v55 = vunpack.c.l.b16 %v2478_v43  ;;  %v2558_v2 = vrot.slane %v2543_v53, 7  ;;  %v2685_v12 = vrot.slane %v2542_v19, 7  ;;  %v2687_v41 = vrot.slane %v2543_v53, 6 }
 0x24d   : > { %v2480_v51 = vpack.c.bf16 %v2460_v26, %v2460_v26  ;;  %v2481_v17 = vpack.c.bf16 %v2461_v35, %v2461_v35  ;;  %v2545_v37 = vunpack.c.l.b16 %v2479_v3  ;;  %v2240_v18 = vpop.f32.mrf.mxu1  ;;  %v4218_v45 = vrot.slane %v2326_v42, 9 }
 0x24e   : > { %v2560_v34 = vsel %vm2559_vm10, %v2558_v2, %v2542_v19  ;;  %v2561_v23 = vrot.slane %v2544_v55, 6  ;;  %v2686_v46 = vsel %vm2559_vm10, %v2685_v12, %v2683_v20  ;;  %v2689_v63 = vrot.slane %v2544_v55, 5 }
 0x24f   : > { %v2688_v16 = vsel %vm865_vm1, %v2687_v41, %v2686_v46  ;;  %v2827_v47 = vrot.slane %v2544_v55, 7  ;;  %v2546_v10 = vunpack.c.l.b16 %v2480_v51  ;;  %v4645_v52 = vpop.f32.mrf.mxu1  ;;  %v5858_v54 = vunpack.c.l.b16 %v2481_v17 }
 0x250   : > { %v2562_v27 = vsel %vm865_vm1, %v2561_v23, %v2560_v34  ;;  %v2563_v44 = vrot.slane %v2545_v37, 5  ;;  %v2691_v60 = vrot.slane %v2545_v37, 4  ;;  %v2690_v58 = vsel %vm2564_vm11, %v2689_v63, %v2688_v16 }
 0x251   : > { %v2566_v57 = vrot.slane %v2546_v10, 4  ;;  %v2828_v7 = vsel %vm2559_vm10, %v2827_v47, %v2543_v53  ;;  %v2568_v9 = vrot.slane %v5858_v54, 3  ;;  %v2693_v33 = vrot.slane %v2546_v10, 3 }
 0x252   : > { %v2565_v61 = vsel %vm2564_vm11, %v2563_v44, %v2562_v27  ;;  %v2829_v24 = vrot.slane %v2545_v37, 6  ;;  %v2831_v39 = vrot.slane %v2546_v10, 5  ;;  %v2280_v32 = vmax.f32 %v2267_v48, 0.0 }
 0x253   : > { %v2246_v25 = vadd.f32 %v5848_v49, %v2019_v14  ;;  %v2247_v59 = vadd.f32 %v2237_v11, %v2024_v22  ;;  %v2692_v31 = vsel %vm867_vm4, %v2691_v60, %v2690_v58  ;;  %v2567_v30 = vsel %vm867_vm4, %v2566_v57, %v2565_v61 }
 0x254   : > { %v2830_v0 = vsel %vm865_vm1, %v2829_v24, %v2828_v7  ;;  %v2462_v5 = vmax.f32 %v2326_v42, %v4218_v45  ;;  %v5871_v38 = vrot.slane %v2279_v56, %v5199_v6  ;;  %v2341_v28 = vrot.slane %v2280_v32, %v5199_v6 }
 0x255   : > { %v2258_v29 = vadd.f32 %v5841_v13, %v2246_v25  ;;  %v2259_v15 = vadd.f32 %v5841_v13, %v2247_v59  ;;  %v5877_v49 = vsel %vm2569_vm12, %v2693_v33, %v2692_v31  ;;  %v5880_v36 = vsel %vm2569_vm12, %v2568_v9, %v2567_v30 }
 0x256   : > { %v5883_v40 = vsel %vm2564_vm11, %v2831_v39, %v2830_v0  ;;  %v2342_v8 = vcombine.high %v2341_v28, %v2341_v28  ;;  %v4221_v11 = vrot.slane %v2341_v28, 9  ;;  %v2482_v20 = vpack.c.bf16 %v2462_v5, %v2462_v5 }
 0x257   : > { %v2268_v43 = vcombine.high %v2258_v29, %v2258_v29  ;;  %v2281_v19 = vmax.f32 %v2258_v29, 0.0  ;;  %v2269_v53 = vcombine.high %v2259_v15, %v2259_v15  ;;  %v2283_v62 = vmax.f32 %v2259_v15, 0.0 }
 0x258   : > { %v4219_v26 = vrot.slane %v5871_v38, 9  ;;  %v4222_v35 = vrot.slane %v2342_v8, 9  ;;  %v2465_v13 = vmax.f32 %v2341_v28, %v4221_v11  ;;  %v5889_v37 = vunpack.c.l.b16 %v2482_v20 }
 0x259   : > { %v2282_v3 = vmax.f32 %v2268_v43, 0.0  ;;  %v2349_v50 = vrot.slane %v2281_v19, %v5199_v6  ;;  %v2365_v55 = vrot.slane %v2283_v62, %v5199_v6  ;;  %v2284_v12 = vmax.f32 %v2269_v53, 0.0 }
 0x25a   : > { %v2466_v2 = vmax.f32 %v2342_v8, %v4222_v35  ;;  %v2463_v18 = vmax.f32 %v5871_v38, %v4219_v26  ;;  %v2483_v34 = vpack.c.bf16 %v2465_v13, %v2465_v13  ;;  %v2695_v24 = vrot.slane %v5858_v54, 2 }
 0x25b   : > { %v2350_v41 = vcombine.high %v2349_v50, %v2349_v50  ;;  %v2357_v42 = vrot.slane %v2282_v3, %v5199_v6  ;;  %v4223_v51 = vrot.slane %v2349_v50, 9  ;;  %v2366_v17 = vcombine.high %v2365_v55, %v2365_v55 }
 0x25c   : > { %v2484_v23 = vpack.c.bf16 %v2466_v2, %v2466_v2  ;;  %v5893_v10 = vrot.slane %v2284_v12, %v5199_v6  ;;  %v4227_v52 = vrot.slane %v2365_v55, 9  ;;  %v2684_v60 = vunpack.c.l.b16 %v2483_v34 }
 0x25d   : > { %v2358_v46 = vcombine.high %v2357_v42, %v2357_v42  ;;  %v4224_v63 = vrot.slane %v2350_v41, 9  ;;  %v4225_v14 = vrot.slane %v2357_v42, 9  ;;  %v2467_v16 = vmax.f32 %v2349_v50, %v4223_v51 }
 0x25e   : > { %v2550_v47 = vunpack.c.l.b16 %v2484_v23  ;;  %v4228_v27 = vrot.slane %v2366_v17, 9  ;;  %v4229_v58 = vrot.slane %v5893_v10, 9  ;;  %v2471_v7 = vmax.f32 %v2365_v55, %v4227_v52 }
 0x25f   : > { %v4226_v44 = vrot.slane %v2358_v46, 9  ;;  %v2468_v48 = vmax.f32 %v2350_v41, %v4224_v63  ;;  %v2469_v22 = vmax.f32 %v2357_v42, %v4225_v14  ;;  %v2485_v57 = vpack.c.bf16 %v2467_v16, %v2467_v16 }
 0x260   : > { %v2699_v56 = vrot.slane %v2550_v47, 7  ;;  %v2507_v39 = vpack.c.bf16 %v2463_v18, %v2463_v18  ;;  %v2472_v25 = vmax.f32 %v2366_v17, %v4228_v27  ;;  %v2473_v28 = vmax.f32 %v5893_v10, %v4229_v58 }
 0x261   : > { %v2470_v45 = vmax.f32 %v2358_v46, %v4226_v44  ;;  %v2486_v61 = vpack.c.bf16 %v2468_v48, %v2468_v48  ;;  %v2487_v9 = vpack.c.bf16 %v2469_v22, %v2469_v22  ;;  %v5896_v33 = vunpack.c.l.b16 %v2485_v57 }
 0x262   : > { %v2700_v32 = vsel %vm2559_vm10, %v2699_v56, %v2684_v60  ;;  %v2489_v29 = vpack.c.bf16 %v2471_v7, %v2471_v7  ;;  %v2490_v15 = vpack.c.bf16 %v2472_v25, %v2472_v25  ;;  %v2571_v53 = vrot.slane %v5889_v37, 2  ;;  %v4865_v25 = vld [vmem:[%s5375_s30 + $0xa8] sm:$0xff]  }
 0x263   : > { %v2488_v59 = vpack.c.bf16 %v2470_v45, %v2470_v45  ;;  %v5900_v31 = vunpack.c.l.b16 %v2486_v61  ;;  %v5902_v30 = vunpack.c.l.b16 %v2487_v9  ;;  %v2576_v0 = vrot.slane %v5896_v33, 7  ;;  %v4863_v61 = vld [vmem:[%s5375_s30 + $0xb8] sm:$0xff]  }
 0x264   : > { %v2701_v5 = vrot.slane %v5896_v33, 6  ;;  %v2697_v20 = vrot.slane %v5889_v37, 1  ;;  %v2833_v26 = vrot.slane %v5858_v54, 4  ;;  %v5916_v35 = vunpack.c.l.b16 %v2507_v39 }
 0x265   : > { %v5907_v8 = vunpack.c.l.b16 %v2488_v59  ;;  %v2577_v11 = vsel %vm2559_vm10, %v2576_v0, %v2550_v47  ;;  %v2578_v43 = vrot.slane %v5900_v31, 6  ;;  %v2580_v19 = vrot.slane %v5902_v30, 5 }
 0x266   : > { %v2703_v62 = vrot.slane %v5900_v31, 5  ;;  %v2702_v3 = vsel %vm865_vm1, %v2701_v5, %v2700_v32  ;;  %v2705_v55 = vrot.slane %v5902_v30, 4  ;;  %v2508_v12 = vpack.c.bf16 %v2473_v28, %v2473_v28 }
 0x267   : > { %v2579_v13 = vsel %vm865_vm1, %v2578_v43, %v2577_v11  ;;  %v2582_v50 = vrot.slane %v5907_v8, 4  ;;  %v2707_v2 = vrot.slane %v5907_v8, 3  ;;  %v5924_v42 = vunpack.c.l.b16 %v2489_v29  ;;  %v4867_v11 = vld [vmem:[%s5375_s30 + $0x98] sm:$0xff]  }
 0x268   : > { %v2581_v41 = vsel %vm2564_vm11, %v2580_v19, %v2579_v13  ;;  %v5926_v51 = vunpack.c.l.b16 %v2490_v15  ;;  %v2696_v54 = vsel %vm869_vm7, %v2695_v24, %v5877_v49  ;;  %v5930_v17 = vunpack.c.l.b16 %v2508_v12  ;;  %v4869_v13 = vld [vmem:[%s5375_s30 + $0x88] sm:$0xff]  }
 0x269   : > { %v2698_v18 = vsel %vm2574_vm13, %v2697_v20, %v2696_v54  ;;  %v2704_v34 = vsel %vm2564_vm11, %v2703_v62, %v2702_v3  ;;  %v2572_v23 = vsel %vm869_vm7, %v2571_v53, %v5880_v36  ;;  %v2584_v46 = vrot.slane %v5924_v42, 3  ;;  %v4868_v53 = vld [vmem:[%s5375_s30 + $0x90] sm:$0xff]  }
 0x26a   : > { %v2586_v63 = vrot.slane %v5926_v51, 2  ;;  %v2709_v14 = vrot.slane %v5924_v42, 2  ;;  %v2573_v16 = vrot.slane %v5916_v35, 1  ;;  %v2588_v49 = vrot.slane %v5930_v17, 1 }
 0x26b   : > { %v2706_v47 = vsel %vm867_vm4, %v2705_v55, %v2704_v34  ;;  %v2711_v52 = vrot.slane %v5926_v51, 1  ;;  %v2583_v44 = vsel %vm867_vm4, %v2582_v50, %v2581_v41  ;;  %v2834_v22 = vsel %vm867_vm4, %v2833_v26, %v5883_v40  ;;  %v4864_v40 = vld [vmem:[%s5375_s30 + $0xb0] sm:$0xff]   ;;  %v4870_v41 = vld [vmem:[%s5375_s30 + $0x80] sm:$0xff]   ;;  %v4872_v34 = vld [vmem:[%s5470_s21 + $0x78] sm:$0xff]  }
 0x26c   : > { %v2708_v27 = vsel %vm2569_vm12, %v2707_v2, %v2706_v47  ;;  %v2585_v48 = vsel %vm2569_vm12, %v2584_v46, %v2583_v44  ;;  %v2835_v56 = vrot.slane %v5889_v37, 3  ;;  %v2575_v7 = vsel %vm2574_vm13, %v2573_v16, %v2572_v23  ;;  %v4873_v23 = vld [vmem:[%s5470_s21 + $0x30] sm:$0xff]   ;;  %v4877_v16 = vld [vmem:[%s5470_s21 + $0x20] sm:$0xff]   ;;  %v4879_v47 = vld [vmem:[%s5470_s21 + $0x18] sm:$0xff]  }
 0x26d   : > { %v2710_v36 = vsel %vm869_vm7, %v2709_v14, %v2708_v27  ;;  %v2587_v60 = vsel %vm869_vm7, %v2586_v63, %v2585_v48  ;;  %v2374_v37 = vcombine.high %v5893_v10, %v5893_v10  ;;  %v2334_v39 = vcombine.high %v5871_v38, %v5871_v38  ;;  %v4866_v10 = vld [vmem:[%s5375_s30 + $0xa0] sm:$0xff]   ;;  %v4874_v46 = vld [vmem:[%s5470_s21 + $0x70] sm:$0xff]   ;;  %v4875_v63 = vld [vmem:[%s5470_s21 + $0x28] sm:$0xff]   ;;  %s645_s30 = scalar_lea.vmem %s6205_s13, %s4133_s24 }
 0x26e   : > { %v2712_v57 = vsel %vm2574_vm13, %v2711_v52, %v2710_v36  ;;  %v2589_v45 = vsel %vm2574_vm13, %v2588_v49, %v2587_v60  ;;  %v2836_v24 = vsel %vm2569_vm12, %v2835_v56, %v2834_v22  ;;  %v2841_v32 = vrot.slane %v5900_v31, 7  ;;  %v4876_v14 = vld [vmem:[%s5470_s21 + $0x68] sm:$0xff]   ;;  %v4878_v49 = vld [vmem:[%s5470_s21 + $0x60] sm:$0xff]   ;;  %v4880_v52 = vld [vmem:[%s5470_s21 + $0x58] sm:$0xff]  }
 0x26f   : > { %v2713_v58 = vpack.c.b16 %v2712_v57, %v2698_v18  ;;  %v2590_v9 = vpack.c.b16 %v2589_v45, %v2575_v7  ;;  %v4230_v59 = vrot.slane %v2374_v37, 9  ;;  %v2843_v0 = vrot.slane %v5902_v30, 6  ;;  %v4871_v18 = vld [vmem:[%s5470_s21 + $0x38] sm:$0xff]   ;;  %v4881_v27 = vld [vmem:[%s5470_s21 + $0x10] sm:$0xff]   ;;  %v4883_v36 = vld [vmem:[%s5470_s21 + $0x8] sm:$0xff]  }
 0x270   : > { %v4220_v5 = vrot.slane %v2334_v39, 9  ;;  %v2842_v28 = vsel %vm2559_vm10, %v2841_v32, %v5896_v33  ;;  %v2845_v38 = vrot.slane %v5907_v8, 5  ;;  %v2847_v30 = vrot.slane %v5924_v42, 4  ;;  %v4882_v44 = vld [vmem:[%s5470_s21 + $0x50] sm:$0xff]   ;;  %v4884_v48 = vld [vmem:[%s5470_s21 + $0x48] sm:$0xff]   ;;  %v4885_v22 = vld [vmem:[%s5470_s21] sm:$0xff]  }
 0x271   : > { %4683 = vmatmul.mubr.bf16.vlgmr.msra.gmra.mxu1 %v2713_v58  ;;  %4663 = vmatmul.mubr.bf16.vlgmr.msra.gmra.mxu0 %v2590_v9  ;;  %v2474_v31 = vmax.f32 %v2374_v37, %v4230_v59  ;;  %v2844_v29 = vsel %vm865_vm1, %v2843_v0, %v2842_v28  ;;  %v2849_v8 = vrot.slane %v5926_v51, 3  ;;  %v2851_v26 = vrot.slane %v5930_v17, 2  ;;  %v4886_v57 = vld [vmem:[%s5470_s21 + $0x40] sm:$0xff]  }
 0x272   : > { %4722 = vmatprep.mubr.msk.bf16.mxu1 %vm5019_vm2, %v5018_v1  ;;  %4687 = vmatpush3.bf16.msra.mxu0 %v4863_v61  ;;  %v2464_v15 = vmax.f32 %v2334_v39, %v4220_v5  ;;  %v2846_v33 = vsel %vm2564_vm11, %v2845_v38, %v2844_v29  ;;  %v2837_v55 = vrot.slane %v5916_v35, 2  ;;  %v4287_v39 = vld [vmem:[%s621_s16] ss:$0 sm:$0xff] }
 0x273   : > { %4702 = vmatprep.mubr.msk.bf16.mxu0 %vm5019_vm2, %v5018_v1  ;;  %4688 = vmatprep.subr.bf16.mxu0 %v5018_v1  ;;  %v2805_v43 = vpack.c.bf16 %v2474_v31, %v2474_v31  ;;  %v2848_v62 = vsel %vm867_vm4, %v2847_v30, %v2846_v33 }
 0x274   : > { %v2804_v19 = vpack.c.bf16 %v2464_v15, %v2464_v15  ;;  %v2850_v50 = vsel %vm2569_vm12, %v2849_v8, %v2848_v62  ;;  %v2838_v51 = vsel %vm869_vm7, %v2837_v55, %v2836_v24  ;;  %4707 = vmatpush3.bf16.msra.mxu1 %v4872_v34 }
 0x275   : > { %v2826_v20 = vunpack.c.l.b16 %v2805_v43  ;;  %v2852_v12 = vsel %vm869_vm7, %v2851_v26, %v2850_v50  ;;  %4708 = vmatprep.subr.bf16.mxu1 %v5018_v1 }
 0x276   : > { %4689 = vmatpush3.bf16.msra.mxu0 %v4864_v40  ;;  %v2825_v3 = vunpack.c.l.b16 %v2804_v19 }
 0x277   : > { %4690 = vmatprep.subr.bf16.mxu0 %v5018_v1  ;;  %v2853_v2 = vrot.slane %v2826_v20, 1 }
 0x278   : > { %v2839_v42 = vrot.slane %v2825_v3, 1  ;;  %4709 = vmatpush3.bf16.msra.mxu1 %v4874_v46 }
 0x279   : > { %v2854_v54 = vsel %vm2574_vm13, %v2853_v2, %v2852_v12  ;;  %4710 = vmatprep.subr.bf16.mxu1 %v5018_v1 }
 0x27a   : > { %4691 = vmatpush3.bf16.msra.mxu0 %v4865_v25  ;;  %v2840_v35 = vsel %vm2574_vm13, %v2839_v42, %v2838_v51 }
 0x27b   : > { %4692 = vmatprep.subr.bf16.mxu0 %v5018_v1  ;;  %v2855_v17 = vpack.c.b16 %v2854_v54, %v2840_v35 }
 0x27c   : > { %4711 = vmatpush3.bf16.msra.mxu1 %v4876_v14 }
 0x27d   : > { %4712 = vmatprep.subr.bf16.mxu1 %v5018_v1 }
 0x27e   : > { %4693 = vmatpush3.bf16.msra.mxu0 %v4866_v10 }
 0x27f   : > { %4694 = vmatprep.subr.bf16.mxu0 %v5018_v1 }
 0x280   : > { %4713 = vmatpush3.bf16.msra.mxu1 %v4878_v49 }
 0x281   : > { %4714 = vmatprep.subr.bf16.mxu1 %v5018_v1 }
 0x282   : > { %4695 = vmatpush3.bf16.msra.mxu0 %v4867_v11 }
 0x283   : > { %4696 = vmatprep.subr.bf16.mxu0 %v5018_v1 }
 0x284   : > { %4715 = vmatpush3.bf16.msra.mxu1 %v4880_v52 }
 0x285   : > { %4716 = vmatprep.subr.bf16.mxu1 %v5018_v1 }
 0x286   : > { %4697 = vmatpush3.bf16.msra.mxu0 %v4868_v53 }
 0x287   : > { %4698 = vmatprep.subr.bf16.mxu0 %v5018_v1 }
 0x288   : > { %4717 = vmatpush3.bf16.msra.mxu1 %v4882_v44 }
 0x289   : > { %4718 = vmatprep.subr.bf16.mxu1 %v5018_v1 }
 0x28a   : > { %4699 = vmatpush3.bf16.msra.mxu0 %v4869_v13 }
 0x28b   : > { %4700 = vmatprep.subr.bf16.mxu0 %v5018_v1 }
 0x28c   : > { %4719 = vmatpush3.bf16.msra.mxu1 %v4884_v48 }
 0x28d   : > { %4720 = vmatprep.subr.bf16.mxu1 %v5018_v1 }
 0x28e   : > { %4701 = vmatpush3.bf16.msra.mxu0 %v4870_v41 }
 0x28f   : > { %4726 = vmatprep.subr.bf16.mxu0 %v5018_v1 }
 0x290   : > { %4721 = vmatpush3.bf16.msra.mxu1 %v4886_v57 }
 0x291   : > { %4703 = vmatmul.mubr.bf16.vlgmr.msra.gmra.mxu0 %v2855_v17  ;;  %4746 = vmatprep.subr.bf16.mxu1 %v5018_v1 }
 0x292   : > { %4742 = vmatprep.mubr.msk.bf16.mxu0 %vm5019_vm2, %v5018_v1  ;;  %4727 = vmatpush3.bf16.msra.mxu0 %v4871_v18 }
 0x293   : > { %4728 = vmatprep.subr.bf16.mxu0 %v5018_v1 }
 0x296   : > { %4729 = vmatpush3.bf16.msra.mxu0 %v4873_v23 }
 0x297   : > { %4730 = vmatprep.subr.bf16.mxu0 %v5018_v1 }
 0x29a   : > { %4731 = vmatpush3.bf16.msra.mxu0 %v4875_v63 }
 0x29b   : > { %4732 = vmatprep.subr.bf16.mxu0 %v5018_v1 }
 0x29e   : > { %4733 = vmatpush3.bf16.msra.mxu0 %v4877_v16 }
 0x29f   : > { %4734 = vmatprep.subr.bf16.mxu0 %v5018_v1 }
 0x2a2   : > { %4735 = vmatpush3.bf16.msra.mxu0 %v4879_v47 }
 0x2a3   : > { %4736 = vmatprep.subr.bf16.mxu0 %v5018_v1 }
 0x2a6   : > { %4737 = vmatpush3.bf16.msra.mxu0 %v4881_v27 }
 0x2a7   : > { %4738 = vmatprep.subr.bf16.mxu0 %v5018_v1 }
 0x2aa   : > { %4739 = vmatpush3.bf16.msra.mxu0 %v4883_v36 }
 0x2ab   : > { %4740 = vmatprep.subr.bf16.mxu0 %v5018_v1 }
 0x2ae   : > { %4741 = vmatpush3.bf16.msra.mxu0 %v4885_v22 }
 0x331   : > { %v2797_v60 = vpop.f32.mrf.mxu1  ;;  %v2674_v56 = vpop.f32.mrf.mxu0 }
 0x332   : > { %v2798_v40 = vadd.f32 %v2797_v60, %v2674_v56 }
 0x333   : > { %v4684_v58 = vpop.f32.mrf.mxu1  ;;  %v4664_v7 = vpop.f32.mrf.mxu0 }
 0x335   : > { %v2800_v45 = vpop.f32.mrf.mxu1  ;;  %v2677_v61 = vpop.f32.mrf.mxu0 }
 0x336   : > { %v2801_v59 = vadd.f32 %v2800_v45, %v2677_v61  ;;  %v4887_v45 = vld [vmem:[%s5470_s21 + $0xb8] sm:$0xff]  }
 0x337   : > { %v4685_v9 = vpop.f32.mrf.mxu1  ;;  %v4665_v24 = vpop.f32.mrf.mxu0 }
 0x338   : > { %v4888_v9 = vld [vmem:[%s5470_s21 + $0xb0] sm:$0xff]   ;;  %v4890_v24 = vld [vmem:[%s5470_s21 + $0xa0] sm:$0xff]  }
 0x351   : > { %v2939_v37 = vpop.f32.mrf.mxu0 }
 0x352   : > { %v2946_v32 = vadd.f32 %v2939_v37, %v2798_v40  ;;  %v4891_v40 = vld [vmem:[%s5470_s21 + $0x98] sm:$0xff]   ;;  %v4892_v37 = vld [vmem:[%s5470_s21 + $0x90] sm:$0xff]  }
 0x353   : > { %v4704_v25 = vpop.f32.mrf.mxu0 }
 0x354   : > { %v2955_v0 = vadd.f32 %v4287_v39, %v2946_v32  ;;  %v4893_v32 = vld [vmem:[%s5470_s21 + $0x88] sm:$0xff]  }
 0x355   : > { %v2942_v5 = vpop.f32.mrf.mxu0 }
 0x356   : > { %v2957_v28 = vmax.f32 %v2955_v0, 0.0  ;;  %v2947_v10 = vadd.f32 %v2942_v5, %v2801_v59  ;;  %v4894_v5 = vld [vmem:[%s5470_s21 + $0x80] sm:$0xff]  }
 0x357   : > { %v4705_v38 = vpop.f32.mrf.mxu0 }
 0x358   : > { %v2961_v31 = vcombine.high %v2957_v28, %v2957_v28  ;;  %v2968_v29 = vrot.slane %v2957_v28, %v5199_v6  ;;  %v2956_v15 = vadd.f32 %v4287_v39, %v2947_v10 }
 0x35a   : > { %v6035_v11 = vrot.slane %v2961_v31, %v5199_v6  ;;  %v6037_v30 = vcombine.high %v2968_v29, %v2968_v29  ;;  %v2958_v43 = vmax.f32 %v2956_v15, 0.0  ;;  %v4288_v62 = vrot.slane %v2968_v29, 9  ;;  %v4897_v15 = vld [vmem:[%s5172_s18 + $0x74] ss:$8 sps:$4 sm:$0xff]  }
 0x35b   : > { %3715 = vmatprep.subr.bf16.mxu0 %v4897_v15 }
 0x35c   : > { %v2993_v33 = vcombine.low %v2968_v29, %v6037_v30  ;;  %v3041_v19 = vrot.slane %v6037_v30, 7  ;;  %v2977_v53 = vcombine.high %v2958_v43, %v2958_v43  ;;  %v6042_v8 = vrot.slane %v2958_v43, %v5199_v6  ;;  %v4895_v29 = vld [vmem:[%s5172_s18 + $0x70] ss:$8 sps:$4 sm:$0xff]   ;;  %v4903_v43 = vld [vmem:[%s5172_s18 + $0x54] ss:$8 sps:$4 sm:$0xff]  }
 0x35d   : > { %v3037_v20 = vcombine.high %v6035_v11, %v6035_v11  ;;  %v3044_v26 = vrot.slane %v6035_v11, 7  ;;  %v3282_v25 = vcombine.low %v6037_v30, %v6035_v11  ;;  %v4898_v30 = vld [vmem:[%s5172_s18 + $0x60] ss:$8 sps:$4 sm:$0xff]  }
 0x35e   : > { %v3043_v13 = vrot.slane %v3041_v19, 2  ;;  %v6048_v3 = vrot.slane %v2977_v53, %v5199_v6  ;;  %v2992_v50 = vcombine.high %v6042_v8, %v6042_v8  ;;  %v3042_v55 = vsel %vm5231_vm8, %v4288_v62, %v3041_v19  ;;  %v4906_v19 = vld [vmem:[%s5172_s18 + $0x44] ss:$8 sps:$4 sm:$0xff]   ;;  %v4904_v53 = vld [vmem:[%s5172_s18 + $0x40] ss:$8 sps:$4 sm:$0xff]  }
 0x35f   : > { %v2994_v2 = vcombine.low %v6035_v11, %v6042_v8  ;;  %v4289_v12 = vrot.slane %v6042_v8, 9  ;;  %v3001_v41 = vrot.slane %v2993_v33, %v5199_v6  ;;  %v3046_v34 = vrot.slane %v3044_v26, 2  ;;  %v4901_v33 = vld [vmem:[%s5172_s18 + $0x50] ss:$8 sps:$4 sm:$0xff]  }
 0x360   : > { %v3038_v42 = vcombine.high %v6048_v3, %v6048_v3  ;;  %v3051_v51 = vrot.slane %v2992_v50, 7  ;;  %v3054_v54 = vrot.slane %v6048_v3, 7  ;;  %v3010_v35 = vcombine.low %v2992_v50, %v6048_v3  ;;  %v4907_v62 = vld [vmem:[%s5172_s18 + $0x30] ss:$8 sps:$4 sm:$0xff]   ;;  %v4918_v50 = vld [vmem:[%s5172_s18 + $0x4] ss:$8 sps:$4 sm:$0xff]  }
 0x361   : > { %v3008_v17 = vrot.slane %v2994_v2, %v5199_v6  ;;  %v3045_v18 = vsel %vm5231_vm8, %v3043_v13, %v3044_v26  ;;  %v3047_v23 = vrot.slane %v3037_v20, 7  ;;  %v4322_v39 = vcombine.high %v6035_v11, %v6042_v8  ;;  %v4900_v11 = vld [vmem:[%s5172_s18 + $0x64] ss:$8 sps:$4 sm:$0xff]   ;;  %v4909_v8 = vld [vmem:[%s5172_s18 + $0x34] ss:$8 sps:$4 sm:$0xff]  }
 0x362   : > { %v3017_v46 = vrot.slane %v3010_v35, %v5199_v6  ;;  %v3052_v63 = vsel %vm5231_vm8, %v4289_v12, %v3051_v51  ;;  %v3053_v14 = vrot.slane %v3051_v51, 2  ;;  %v3056_v16 = vrot.slane %v3054_v54, 2  ;;  %v4912_v20 = vld [vmem:[%s5172_s18 + $0x24] ss:$8 sps:$4 sm:$0xff]   ;;  %v4910_v26 = vld [vmem:[%s5172_s18 + $0x20] ss:$8 sps:$4 sm:$0xff]  }
 0x363   : > { %v3009_v49 = vcombine.low %v3001_v41, %v3008_v17  ;;  %v3048_v47 = vsel %vm5231_vm8, %v3046_v34, %v3047_v23  ;;  %v3057_v52 = vrot.slane %v3038_v42, 7  ;;  %v3059_v27 = vcombine.low %v3042_v55, %v3045_v18  ;;  %v4915_v13 = vld [vmem:[%s5172_s18 + $0x14] ss:$8 sps:$4 sm:$0xff]   ;;  %v4916_v55 = vld [vmem:[%s5172_s18] ss:$8 sps:$4 sm:$0xff]  }
 0x364   : > { %v3055_v44 = vsel %vm5231_vm8, %v3053_v14, %v3054_v54  ;;  %v3060_v36 = vcombine.low %v3048_v47, %v3052_v63  ;;  %v3299_v59 = vcombine.low %v6048_v3, %v3038_v42  ;;  %v3297_v0 = vrot.slane %v4322_v39, %v5199_v6  ;;  %v4913_v3 = vld [vmem:[%s5172_s18 + $0x10] ss:$8 sps:$4 sm:$0xff]   ;;  %v4921_v2 = vld [vmem:[%s5172_s18 + $0xb4] ss:$8 sps:$4 sm:$0xff]   ;;  %v4924_v41 = vld [vmem:[%s5172_s18 + $0xa4] ss:$8 sps:$4 sm:$0xff]  }
 0x365   : > { %v3020_v48 = vpack.c.bf16 %v3017_v46, %v3009_v49  ;;  %v3058_v22 = vsel %vm5231_vm8, %v3056_v16, %v3057_v52  ;;  %v3067_v57 = vrot.slane %v3059_v27, %v5199_v6  ;;  %v3290_v28 = vrot.slane %v3282_v25, %v5199_v6  ;;  %v4919_v12 = vld [vmem:[%s5172_s18 + $0xb0] ss:$8 sps:$4 sm:$0xff]   ;;  %v4922_v42 = vld [vmem:[%s5172_s18 + $0xa0] ss:$8 sps:$4 sm:$0xff]   ;;  %v4927_v51 = vld [vmem:[%s5172_s18 + $0x94] ss:$8 sps:$4 sm:$0xff]  }
 0x366   : > { %v3074_v60 = vrot.slane %v3060_v36, %v5199_v6  ;;  %v3076_v56 = vcombine.low %v3055_v44, %v3058_v22  ;;  %v3306_v10 = vrot.slane %v3299_v59, %v5199_v6  ;;  %v4925_v54 = vld [vmem:[%s5172_s18 + $0x90] ss:$8 sps:$4 sm:$0xff]   ;;  %v4347_v47 = vld [vmem:[%s629_s17] ss:$0 sm:$0xff] }
 0x367   : > { %4743 = vmatmul.mubr.bf16.vlgmr.msra.gmra.mxu0 %v3020_v48  ;;  %v3298_v38 = vcombine.low %v3290_v28, %v3297_v0 }
 0x368   : > { %v3075_v58 = vcombine.low %v3067_v57, %v3074_v60  ;;  %v3083_v7 = vrot.slane %v3076_v56, %v5199_v6  ;;  %3716 = vmatpush1.bf16.msra.mxu0 %v4895_v29 }
 0x369   : > { %v3309_v31 = vpack.c.bf16 %v3306_v10, %v3298_v38  ;;  %3717 = vmatprep.subr.bf16.mxu0 %v4900_v11 }
 0x36a   : > { %v3086_v61 = vpack.c.bf16 %v3083_v7, %v3075_v58 }
 0x36c   : > { %4723 = vmatmul.mubr.bf16.vlgmr.msra.gmra.mxu1 %v3086_v61  ;;  %3718 = vmatpush1.bf16.msra.mxu0 %v4898_v30 }
 0x36d   : > { %4747 = vmatpush3.bf16.msra.mxu1 %v4887_v45  ;;  %4762 = vmatprep.mubr.msk.bf16.mxu1 %vm5019_vm2, %v5018_v1 }
 0x36e   : > { %4748 = vmatprep.subr.bf16.mxu1 %v5018_v1  ;;  %3719 = vmatprep.subr.bf16.mxu0 %v4903_v43 }
 0x370   : > { %3720 = vmatpush1.bf16.msra.mxu0 %v4901_v33 }
 0x371   : > { %4749 = vmatpush3.bf16.msra.mxu1 %v4888_v9  ;;  %3721 = vmatprep.subr.bf16.mxu0 %v4906_v19 }
 0x372   : > { %4750 = vmatprep.subr.bf16.mxu1 %v5018_v1 }
 0x374   : > { %3722 = vmatpush1.bf16.msra.mxu0 %v4904_v53 }
 0x375   : > { %4751 = vmatpush3.bf16.msra.mxu1 %v4889_v21  ;;  %3723 = vmatprep.subr.bf16.mxu0 %v4909_v8 }
 0x376   : > { %4752 = vmatprep.subr.bf16.mxu1 %v5018_v1 }
 0x378   : > { %3724 = vmatpush1.bf16.msra.mxu0 %v4907_v62 }
 0x379   : > { %4753 = vmatpush3.bf16.msra.mxu1 %v4890_v24  ;;  %3725 = vmatprep.subr.bf16.mxu0 %v4912_v20 }
 0x37a   : > { %4754 = vmatprep.subr.bf16.mxu1 %v5018_v1 }
 0x37c   : > { %3726 = vmatpush1.bf16.msra.mxu0 %v4910_v26 }
 0x37d   : > { %4755 = vmatpush3.bf16.msra.mxu1 %v4891_v40  ;;  %3727 = vmatprep.subr.bf16.mxu0 %v4915_v13  ;;  %v5021_v40 = vmov 1934713408  }
 0x37e   : > { %4756 = vmatprep.subr.bf16.mxu1 %v5018_v1 }
 0x380   : > { %3728 = vmatpush1.bf16.msra.mxu0 %v4913_v3 }
 0x381   : > { %4757 = vmatpush3.bf16.msra.mxu1 %v4892_v37  ;;  %3729 = vmatprep.subr.bf16.mxu0 %v4918_v50  ;;  %v3526_v37 = vunpack.c.l.s4 %v5021_v40 }
 0x382   : > { %4758 = vmatprep.subr.bf16.mxu1 %v5018_v1 }
 0x383   : > { %v3527_v38 = vunpack.c.0.s8 %v3526_v37 }
 0x384   : > { %3730 = vmatpush1.bf16.msra.mxu0 %v4916_v55 }
 0x385   : > { %4759 = vmatpush3.bf16.msra.mxu1 %v4893_v32  ;;  %3739 = vmatprep.subr.bf16.mxu0 %v4921_v2  ;;  %v3530_v8 = vsub.s32 %v3527_v38, %v5188_v4  ;;  %v4928_v2 = vld [vmem:[%s5172_s18 + $0x80] ss:$8 sps:$4 sm:$0xff]  }
 0x386   : > { %4760 = vmatprep.subr.bf16.mxu1 %v5018_v1 }
 0x388   : > { %3740 = vmatpush2.bf16.msra.mxu0 %v4919_v12  ;;  %v4930_v12 = vld [vmem:[%s5172_s18 + $0x84] ss:$8 sps:$4 sm:$0xff]   ;;  %s5022_s18 = smov 64  }
 0x389   : > { %4761 = vmatpush3.bf16.msra.mxu1 %v4894_v5  ;;  %3741 = vmatprep.subr.bf16.mxu0 %v4924_v41 }
 0x38c   : > { %4763 = vmatmul.mubr.bf16.vlgmr.msra.gmra.mxu1 %v3309_v31  ;;  %3742 = vmatpush2.bf16.msra.mxu0 %v4922_v42 }
 0x38d   : > { %3743 = vmatprep.subr.bf16.mxu0 %v4927_v51 }
 0x390   : > { %3744 = vmatpush2.bf16.msra.mxu0 %v4925_v54  ;;  %v4931_v54 = vld [vmem:[%s5505_s14 + $0x78] sm:$0xff]  }
 0x391   : > { %3745 = vmatprep.subr.bf16.mxu0 %v4930_v12  ;;  %4498 = vmatprep.subr.bf16.mxu1 %v4931_v54 }
 0x394   : > { %3746 = vmatpush2.bf16.msra.mxu0 %v4928_v2 }
 0x427   : > { %v3275_v35 = vpop.f32.mrf.mxu0 }
 0x429   : > { %v4744_v17 = vpop.f32.mrf.mxu0 }
 0x42a   : > { %v4933_v17 = vld [vmem:[%s5505_s14 + $0x70] sm:$0xff]  }
 0x42b   : > { %v3278_v18 = vpop.f32.mrf.mxu0 }
 0x42c   : > { %v3186_v34 = vpop.f32.mrf.mxu1 }
 0x42d   : > { %v4745_v23 = vpop.f32.mrf.mxu0  ;;  %v3276_v16 = vadd.f32 %v3275_v35, %v3186_v34  ;;  %v4932_v35 = vld [vmem:[%s5505_s14 + $0x38] sm:$0xff]  }
 0x42e   : > { %v4724_v46 = vpop.f32.mrf.mxu1  ;;  %4499 = vmatpush3.bf16.msra.mxu1 %v4932_v35 }
 0x42f   : > { %4500 = vmatprep.subr.bf16.mxu1 %v4933_v17 }
 0x430   : > { %v3189_v63 = vpop.f32.mrf.mxu1 }
 0x431   : > { %v3279_v44 = vadd.f32 %v3278_v18, %v3189_v63  ;;  %v4934_v63 = vld [vmem:[%s5505_s14 + $0x30] sm:$0xff]  }
 0x432   : > { %v4725_v14 = vpop.f32.mrf.mxu1  ;;  %4501 = vmatpush3.bf16.msra.mxu1 %v4934_v63 }
 0x44c   : > { %v3409_v49 = vpop.f32.mrf.mxu1 }
 0x44d   : > { %v3416_v52 = vadd.f32 %v3409_v49, %v3276_v16  ;;  %v4935_v16 = vld [vmem:[%s5505_s14 + $0x68] sm:$0xff]  }
 0x44e   : > { %v4764_v27 = vpop.f32.mrf.mxu1  ;;  %4502 = vmatprep.subr.bf16.mxu1 %v4935_v16 }
 0x44f   : > { %v3425_v36 = vadd.f32 %v4347_v47, %v3416_v52  ;;  %v4937_v27 = vld [vmem:[%s5505_s14 + $0x60] sm:$0xff]  }
 0x450   : > { %v3412_v48 = vpop.f32.mrf.mxu1 }
 0x451   : > { %v3429_v22 = vcombine.high %v3425_v36, %v3425_v36  ;;  %v3436_v57 = vrot.slane %v3425_v36, %v5199_v6  ;;  %v3417_v60 = vadd.f32 %v3412_v48, %v3279_v44  ;;  %v4938_v44 = vld [vmem:[%s5505_s14 + $0x20] sm:$0xff]   ;;  %v4939_v36 = vld [vmem:[%s5505_s14 + $0x58] sm:$0xff]  }
 0x452   : > { %v4765_v56 = vpop.f32.mrf.mxu1  ;;  %v4940_v48 = vld [vmem:[%s5505_s14 + $0x18] sm:$0xff]  }
 0x453   : > { %v3443_v58 = vrot.slane %v3429_v22, %v5199_v6  ;;  %v3444_v7 = vcombine.high %v3436_v57, %v3436_v57  ;;  %v3460_v45 = vmax.f32 %v3436_v57, 0.0  ;;  %v3426_v61 = vadd.f32 %v4347_v47, %v3417_v60  ;;  %v4936_v47 = vld [vmem:[%s5505_s14 + $0x28] sm:$0xff]   ;;  %v4942_v22 = vld [vmem:[%s5505_s14 + $0x10] sm:$0xff]  }
 0x454   : > { %4503 = vmatpush3.bf16.msra.mxu1 %v4936_v47  ;;  %v4943_v56 = vld [vmem:[%s5505_s14 + $0x48] sm:$0xff]  }
 0x455   : > { %v3445_v9 = vcombine.high %v3443_v58, %v3443_v58  ;;  %v3461_v21 = vmax.f32 %v3444_v7, 0.0  ;;  %v3462_v24 = vmax.f32 %v3443_v58, 0.0  ;;  %v3452_v39 = vrot.slane %v3426_v61, %v5199_v6  ;;  %4504 = vmatprep.subr.bf16.mxu1 %v4937_v27  ;;  %v4944_v58 = vld [vmem:[%s5505_s14 + $0x8] sm:$0xff]   ;;  %v4945_v7 = vld [vmem:[%s5505_s14 + $0x40] sm:$0xff]  }
 0x456   : > { %v4348_v25 = vrot.slane %v3460_v45, 9  ;;  %v3584_v61 = vsub.s32 0, %v5188_v4 }
 0x457   : > { %v3463_v32 = vmax.f32 %v3445_v9, 0.0  ;;  %v4349_v59 = vrot.slane %v3461_v21, 9  ;;  %v3453_v0 = vcombine.high %v3452_v39, %v3452_v39  ;;  %v3464_v5 = vmax.f32 %v3452_v39, 0.0  ;;  %v3580_v9 = vld [vmem:[%s633_s19] sm:$0x3] }
 0x458   : > { %v4350_v28 = vrot.slane %v3462_v24, 9  ;;  %v3490_v11 = vmax.f32 %v3460_v45, %v4348_v25  ;;  %4505 = vmatpush3.bf16.msra.mxu1 %v4938_v44  ;;  %v4946_v45 = vld [vmem:[%s5505_s14] sm:$0xff]  }
 0x459   : > { %v3491_v10 = vmax.f32 %v3461_v21, %v4349_v59  ;;  %v4351_v31 = vrot.slane %v3463_v32, 9  ;;  %v3465_v29 = vmax.f32 %v3453_v0, 0.0  ;;  %v4352_v15 = vrot.slane %v3464_v5, 9  ;;  %4506 = vmatprep.subr.bf16.mxu1 %v4939_v36 }
 0x45a   : > { %v3492_v19 = vmax.f32 %v3462_v24, %v4350_v28  ;;  %v3588_v21 = vsub.s32 1, %v5188_v4  ;;  %v3585_v24 = vrot.slane %v3580_v9, %v3584_v61 }
 0x45b   : > { %v3504_v30 = vrot.slane %v3491_v10, 7  ;;  %v4353_v43 = vrot.slane %v3465_v29, 9  ;;  %v3494_v33 = vmax.f32 %v3464_v5, %v4352_v15  ;;  %v3493_v62 = vmax.f32 %v3463_v32, %v4351_v31  ;;  %v4379_v31 = vld [vmem:[%s641_s25] ss:$0 sm:$0xff] }
 0x45c   : > { %4507 = vmatpush3.bf16.msra.mxu1 %v4940_v48  ;;  %v3589_v40 = vrot.slane %v3580_v9, %v3588_v21 }
 0x45d   : > { %v3505_v53 = vsel %vm2559_vm10, %v3504_v30, %v3490_v11  ;;  %v3495_v20 = vmax.f32 %v3465_v29, %v4353_v43  ;;  %v3513_v26 = vrot.slane %v3494_v33, 7 }
 0x45e   : > { %v3506_v13 = vsel %vm2564_vm11, %v3504_v30, %v3505_v53 }
 0x45f   : > { %v3533_v3 = vcombine.low %v3492_v19, %v3495_v20  ;;  %v3507_v50 = vsel %vm2569_vm12, %v3504_v30, %v3506_v13  ;;  %v3514_v55 = vsel %vm2559_vm10, %v3513_v26, %v3493_v62 }
 0x460   : > { %v3515_v41 = vsel %vm2564_vm11, %v3513_v26, %v3514_v55  ;;  %v3508_v18 = vsel %vm2574_vm13, %v3504_v30, %v3507_v50 }
 0x461   : > { %v3540_v42 = vrot.slane %v3533_v3, %v3530_v8  ;;  %v3516_v51 = vsel %vm2569_vm12, %v3513_v26, %v3515_v41 }
 0x462   : > { %v3517_v34 = vsel %vm2574_vm13, %v3513_v26, %v3516_v51 }
 0x463   : > { %v3555_v23 = vpack.c.bf16 %v3540_v42, %v3540_v42  ;;  %v3524_v46 = vcombine.low %v3508_v18, %v3517_v34 }
 0x465   : > { %4378 = vmatprep.mubr.msk.bf16.mxu0 %vm3552_vm14, %v3555_v23  ;;  %v3531_v14 = vrot.slane %v3524_v46, %v3530_v8 }
 0x467   : > { %v3532_v49 = vcombine.high %v3531_v14, %v5018_v1  ;;  %v4941_v1 = vld [vmem:[%s5505_s14 + $0x50] sm:$0xff]  }
 0x468   : > { %4508 = vmatprep.subr.bf16.mxu1 %v4941_v1 }
 0x469   : > { %v3548_v52 = vrot.slane %v3532_v49, %v5199_v6  ;;  %4509 = vmatpush3.bf16.msra.mxu1 %v4942_v22 }
 0x46a   : > { %4510 = vmatprep.subr.bf16.mxu1 %v4943_v56 }
 0x46b   : > { %3549 = vrot.lane.b32.xlu0 %v3548_v52, %s5022_s18 }
 0x46d   : > { %4511 = vmatpush3.bf16.msra.mxu1 %v4944_v58 }
 0x46e   : > { %4512 = vmatprep.subr.bf16.mxu1 %v4945_v7 }
 0x471   : > { %4513 = vmatpush3.bf16.msra.mxu1 %v4946_v45 }
 0x4dd   : > { %v3550_v6 = vpop.permute.xlu0 %3549 }
 0x4de   : > { %v3553_v57 = vsel %vm3552_vm14, %v3531_v14, %v3550_v6 }
 0x4df   : > { %v3554_v60 = vpack.c.bf16 %v3553_v57, %v3553_v57 }
 0x4e1   : > { %3748 = vmatmul.mubr.bf16.vlgmr.msra.gmra.mxu0 %v3554_v60 }
 0x5a1   : > { %v3749_v37 = vpop.f32.mrf.mxu0 }
 0x5a2   : > { %v3750_v39 = vadd.f32 %v3749_v37, %v3585_v24 }
 0x5a3   : > { %v3751_v32 = vpop.f32.mrf.mxu0 }
 0x5a4   : > { %v3752_v25 = vadd.f32 %v3751_v32, %v3589_v40  ;;  %v3756_v59 = vmax.f32 %v3750_v39, 0.0 }
 0x5a5   : > { %v3753_v0 = vpop.f32.mrf.mxu0 }
 0x5a6   : > { %v3757_v5 = vmax.f32 %v3752_v25, 0.0  ;;  %v3758_v38 = vpack.c.bf16 %v3756_v59, %v3756_v59 }
 0x5a7   : > { %v3754_v28 = vpop.f32.mrf.mxu0 }
 0x5a8   : > { %v3759_v10 = vpack.c.bf16 %v3757_v5, %v3757_v5 }
 0x5aa   : > { %3927 = vmatprep.mubr.bf16.mxu1 %v3759_v10 }
 0x5ab   : > { %3928 = vmatmul.mubr.bf16.vlgmr.msra.gmra.mxu1 %v3758_v38 }
 0x66b   : > { %v4514_v4 = vpop.f32.mrf.mxu1 }
 0x66d   : > { %v4515_v29 = vpop.f32.mrf.mxu1 }
 0x66e   : > { %v4516_v15 = vadd.f32 %v4515_v29, %v4514_v4 }
 0x66f   : > { %v4517_v11 = vpop.f32.mrf.mxu1 }
 0x670   : > { %v3930_v30 = vadd.f32 %v4516_v15, %v4379_v31 }
 0x671   : > { %v4518_v43 = vpop.f32.mrf.mxu1 }
 0x672   : > { %v3935_v33 = vsub.f32 0.0, %v3930_v30 }
 0x674   : > { %v3936_v19 = vmul.f32 1.442695, %v3935_v33 }
 0x676   : > { %4947 = vpow2.f32 %v3936_v19 }
 0x683   : > { %v4948_v53 = vpop.eup %4947 }
 0x684   : > { %v3938_v8 = vadd.f32 1.0, %v4948_v53 }
 0x686   : > { %4949 = vrcp.f32 %v3938_v8 }
 0x693   : > { %v4950_v62 = vpop.eup %4949 }
 0x694   : > { %3941 = vst.msk [vmem:[%s645_s30] sm:$0x3] %vm3940_vm15, %v4950_v62 }
 0x695 PF: > { %s6221_s28 = sld [smem:[#allocation6_spill]]  ;;  %s6224_s25 = smov %s5005_s26 }
 0x696   : > { %s6222_s16 = sld [smem:[#allocation5_spill]] }
 0x697   : > { %s6223_s27 = sld [smem:[#allocation7_spill]] }
 0x69b   : > { %p23_p8 = scmp.ge.s32.totalorder %s6221_s28, 5  }
 0x69c   : > { %s6225_s26 = smov %s6222_s16 }
 0x69d   :  { %25 = sbr.rel (!%p23_p8) target bundleno = 3 (0x3), region = 153 }
 0x6a2   :  { %3961 = vsyncpa [#allocation3], 1 }
 0x6a3   :  { %3963 = vsyncpa [#allocation3 + $0x1], 1 }

</bundles_post_ra>
